<compile_context>
chip_gen: v6e
topology: v6e:2x2x1
jax: 0.10.0
libtpu: 0.0.40
codegen_flags: <defaults>
</compile_context>

<pallas_src>
import jax
import jax.numpy as jnp
from jax.experimental import pallas as pl
from jax.experimental.pallas import tpu as pltpu

INPUT_SIZE = 1000          # K (kept unpadded; 1000 % 8 == 0, full-dim blocks)
OUTPUT_SIZE = 500          # true N
N_PAD = 512                # N padded to a multiple of 128 lanes (exact: zeros)
N_BLOCKS = 2               # v7x only: one half of N per TensorCore
N_BLK = N_PAD // N_BLOCKS


def _linear_kernel(x_ref, w_ref, b_ref, o_ref):
    # One MXU matmul with f32 accumulation; bias add on the VPU in f32
    # (safe on v5e, which has no bf16 VPU).
    acc = jnp.dot(x_ref[...], w_ref[...], preferred_element_type=jnp.float32)
    o_ref[...] = (acc + b_ref[...]).astype(o_ref.dtype)


def _cost(batch):
    return pl.CostEstimate(
        flops=2 * batch * INPUT_SIZE * N_PAD,
        transcendentals=0,
        bytes_accessed=(batch * INPUT_SIZE        # x
                        + INPUT_SIZE * N_PAD      # weight
                        + N_PAD                   # bias
                        + batch * N_PAD) * 4,     # output
    )


def make_linear_forward(two_way_split: bool):
    """Returns a jitted forward(x, w_t_p, b_p) -> (batch, 500)."""

    if two_way_split:
        # v7x: split N across the two TensorCores (explicit core-parallel axis).
        def padded_call(x, w_t_p, b_p):
            batch = x.shape[0]
            return pl.pallas_call(
                _linear_kernel,
                out_shape=jax.ShapeDtypeStruct((batch, N_PAD), x.dtype),
                grid=(N_BLOCKS,),
                in_specs=[
                    pl.BlockSpec((batch, INPUT_SIZE), lambda j: (0, 0)),   # x reused
                    pl.BlockSpec((INPUT_SIZE, N_BLK), lambda j: (0, j)),   # W half
                    pl.BlockSpec((1, N_BLK), lambda j: (0, j)),            # b half
                ],
                out_specs=pl.BlockSpec((batch, N_BLK), lambda j: (0, j)),
                compiler_params=pltpu.CompilerParams(
                    dimension_semantics=(pltpu.CORE_PARALLEL,),
                ),
                cost_estimate=_cost(batch),
            )(x, w_t_p, b_p)
    else:
        # v5e / v6e (single TensorCore): no grid, one lane-dense block.
        # Whole arrays are brought into VMEM (well under the scoped limit:
        # ~2 MiB weight + <0.1 MiB activations).
        def padded_call(x, w_t_p, b_p):
            batch = x.shape[0]
            return pl.pallas_call(
                _linear_kernel,
                out_shape=jax.ShapeDtypeStruct((batch, N_PAD), x.dtype),
                cost_estimate=_cost(batch),
            )(x, w_t_p, b_p)

    @jax.jit
    def forward(x, w_t_p, b_p):
        # Slice back to the true 500 outputs inside the jit so XLA fuses it.
        return padded_call(x, w_t_p, b_p)[:, :OUTPUT_SIZE]

    return forward


def init_params(key, input_size=INPUT_SIZE, output_size=OUTPUT_SIZE):
    """Deterministic init mimicking nn.Linear's default (Kaiming-uniform-ish).

    Returns PyTorch-layout params (for the reference check) plus the
    pre-transposed, N-zero-padded kernel params (one-time cost at init).
    """
    k_w, k_b = jax.random.split(key)
    bound = 1.0 / (input_size ** 0.5)
    weight = jax.random.uniform(
        k_w, (output_size, input_size), jnp.float32, minval=-bound, maxval=bound
    )
    bias = jax.random.uniform(
        k_b, (output_size,), jnp.float32, minval=-bound, maxval=bound
    )
    w_t_p = (
        jnp.zeros((input_size, N_PAD), jnp.float32)
        .at[:, :output_size]
        .set(weight.T)
    )
    b_p = jnp.zeros((1, N_PAD), jnp.float32).at[:, :output_size].set(bias)
    return weight, bias, w_t_p, b_p


def _want_core_parallel_split():
    """Use the 2-way cross-TC split only on v7x-class (2 TensorCore) chips."""
    try:
        kind = jax.devices()[0].device_kind.lower()
    except Exception:
        return False
    return ("v7" in kind) or ("7x" in kind)


if __name__ == "__main__":
    key = jax.random.PRNGKey(0)
    k_params, k_x = jax.random.split(key)

    batch = 8
    weight, bias, w_t_p, b_p = init_params(k_params)
    x = jax.random.normal(k_x, (batch, INPUT_SIZE), jnp.float32)

    y = None
    if _want_core_parallel_split():
        try:
            forward = make_linear_forward(two_way_split=True)
            y = jax.block_until_ready(forward(x, w_t_p, b_p))
        except Exception:
            y = None  # fall back to the portable single-block kernel
    if y is None:
        forward = make_linear_forward(two_way_split=False)
        y = jax.block_until_ready(forward(x, w_t_p, b_p))

    # Reference check against plain JAX (PyTorch semantics: x @ W.T + b).
    y_ref = x @ weight.T + bias
    assert y.shape == (batch, OUTPUT_SIZE)
    assert jnp.allclose(y, y_ref, atol=1e-4, rtol=1e-4)

    print("KERNEL_OK")
</pallas_src>

<mosaic_0001>
module attributes {stable_mosaic.version = 11 : i64} {
  func.func @_linear_kernel(%arg0: memref<8x1000xf32, #tpu.memory_space<vmem>>, %arg1: memref<1000x512xf32, #tpu.memory_space<vmem>>, %arg2: memref<1x512xf32, #tpu.memory_space<vmem>>, %arg3: memref<8x512xf32, #tpu.memory_space<vmem>>) attributes {dimension_semantics = [], scalar_prefetch = 0 : i64, scratch_operands = 0 : i64, tpu.core_type = #tpu.core_type<tc>} {
    %c0 = arith.constant 0 : index
    %c0_0 = arith.constant 0 : index
    %0 = vector.load %arg0[%c0, %c0_0] : memref<8x1000xf32, #tpu.memory_space<vmem>>, vector<8x1000xf32>
    %c0_1 = arith.constant 0 : index
    %c0_2 = arith.constant 0 : index
    %1 = vector.load %arg1[%c0_1, %c0_2] : memref<1000x512xf32, #tpu.memory_space<vmem>>, vector<1000x512xf32>
    %cst = arith.constant dense<0.000000e+00> : vector<8x512xf32>
    %2 = tpu.matmul %0, %1, %cst {dimension_numbers = #tpu.dot_dimension_numbers<[1], [0], [0], [1], [0, 0, 1, 1], [], []>} : vector<8x1000xf32>, vector<1000x512xf32>, vector<8x512xf32> -> vector<8x512xf32>
    %c0_3 = arith.constant 0 : index
    %c0_4 = arith.constant 0 : index
    %3 = vector.load %arg2[%c0_3, %c0_4] : memref<1x512xf32, #tpu.memory_space<vmem>>, vector<1x512xf32>
    %4 = vector.broadcast %3 : vector<1x512xf32> to vector<8x512xf32>
    %5 = arith.addf %2, %4 : vector<8x512xf32>
    %c0_5 = arith.constant 0 : index
    %c0_6 = arith.constant 0 : index
    %6 = vector.load %arg3[%c0_5, %c0_6] : memref<8x512xf32, #tpu.memory_space<vmem>>, vector<8x512xf32>
    tpu.vector_store %arg3[%c0_5, %c0_6], %5 {strides = array<i32>} : memref<8x512xf32, #tpu.memory_space<vmem>>, vector<8x512xf32>,
    return
  }
}

</mosaic_0001>

<bundles_post_ra>
// kernel: forward.1
= control target key start
LH: loop header
LB: loop body
LE: loop exit
PB: predicated region body
PF: predicated region fallthrough
CT: control target
= control target key end

     0   :  { %8 = vsyncpa [#allocation3], 0  ;;  %s1325_s0 = inlined_call_operand.hbm [shape: f32[8,1000], index: 0, kind: input, shape index: {}]   ;;  %s1326_s1 = inlined_call_operand.hbm [shape: f32[1000,512], index: 1, kind: input, shape index: {}]   ;;  %s1327_s2 = inlined_call_operand.hbm [shape: f32[1,512], index: 2, kind: input, shape index: {}]   ;;  %s1328_s3 = inlined_call_operand.hbm [shape: f32[8,512], index: 3, kind: output, shape index: {}]  }
   0x1   :  { %9 = vsyncpa [#allocation6], 0 }
   0x2   :  { %10 = vsyncpa [#allocation4], 0  ;;  %s1273_s12 = smov [#allocation5]  }
   0x3   :  { %s26_s13 = sshll.u32 %s1273_s12, 4  ;;  %s27_s13 = int_to_ptr.vmem [resolvable:$true] %s26_s13 }
   0x4   :  { %s1195_s14 = scalar_lea.vmem %s27_s13, 64000  ;;  %p1200_p1 = scmp.lt.s32.totalorder %s27_s13, %s27_s13 }
   0x5   :  { %p1196_p0 = scmp.ne.s32.totalorder %s27_s13, %s1195_s14  ;;  %p1201_p2 = scmp.lt.s32.totalorder %s1195_s14, %s1195_s14 }
   0x7   :  { %p1202_p3 = por %p1201_p2, %p1200_p1 }
   0x9   :  { %p1203_p4 = pnand %p1202_p3, %p1196_p0 }
   0xb   :  { %1206 = shalt.err (!%p1203_p4)
}
   0xc   :  { %s1274_s15 = smov 512   ;;  %s1275_s16 = smov 32  }
   0xd   :  { %32 = dma.hbm_to_vmem [thread:$0]  %s1326_s1, 64000, %s27_s13, [#allocation6], %s1274_s15, %s1274_s15, %s1275_s16  }
   0xe   :  { %s1276_s19 = smov [#allocation2]   ;;  %s1277_s21 = smov [#allocation7]  }
   0xf   :  { %s17_s20 = sshll.u32 %s1276_s19, 4  ;;  %s39_s22 = sshll.u32 %s1277_s21, 4  ;;  %s18_s20 = int_to_ptr.vmem [resolvable:$true] %s17_s20  ;;  %s40_s22 = int_to_ptr.vmem [resolvable:$true] %s39_s22 }
  0x10   :  { %s1215_s23 = scalar_lea.vmem %s18_s20, 1024  ;;  %p1220_p6 = scmp.lt.s32.totalorder %s18_s20, %s18_s20 }
  0x11   :  { %p1216_p5 = scmp.ne.s32.totalorder %s18_s20, %s1215_s23  ;;  %p1221_p7 = scmp.lt.s32.totalorder %s1215_s23, %s1215_s23 }
  0x13   :  { %p1222_p8 = por %p1221_p7, %p1220_p6 }
  0x15   :  { %p1223_p9 = pnand %p1222_p8, %p1216_p5 }
  0x17   :  { %1226 = shalt.err (!%p1223_p9)
}
  0x18   :  { %20 = dma.hbm_to_vmem [thread:$0]  %s1325_s0, 1024, %s18_s20, [#allocation3]  }
  0x19   :  { %s1235_s26 = scalar_lea.vmem %s40_s22, 64  ;;  %p1240_p11 = scmp.lt.s32.totalorder %s40_s22, %s40_s22 }
  0x1a   :  { %p1236_p10 = scmp.ne.s32.totalorder %s40_s22, %s1235_s26  ;;  %p1241_p12 = scmp.lt.s32.totalorder %s1235_s26, %s1235_s26 }
  0x1c   :  { %p1242_p13 = por %p1241_p12, %p1240_p11 }
  0x1e   :  { %p1243_p0 = pnand %p1242_p13, %p1236_p10 }
  0x20   :  { %1246 = shalt.err (!%p1243_p0)
}
  0x21   :  { %42 = dma.hbm_to_vmem [thread:$0]  %s1327_s2, 64, %s40_s22, [#allocation6]  }
  0x22   :  { %1267 = dma.done.wait [#allocation3], 1024  }
  0x23   :  { %1268 = vsyncadd [#allocation3], 4294966272 }
  0x24   :  { %1269 = dma.done.wait [#allocation6], 64064  }
  0x25   :  { %1270 = vsyncadd [#allocation6], 4294903232  ;;  %v121_v0 = vld [vmem:[#allocation5 + $0x1e8] sm:$0xff]  ;;  %v120_v2 = vld [vmem:[#allocation5 + $0x1e0] sm:$0xff]  ;;  %vm582_vm0 = vcmask 850944   ;;  %s1278_s0 = smov [#allocation8]  }
  0x26   :  { %v249_v1 = vld [vmem:[#allocation5 + $0x5e8] sm:$0xff]  ;;  %586 = vmatprep.subr.mxu0 %v121_v0  ;;  %v248_v3 = vld [vmem:[#allocation5 + $0x5e0] sm:$0xff]  ;;  %s1164_s2 = sshll.u32 %s1278_s0, 4  ;;  %s1165_s2 = int_to_ptr.vmem [resolvable:$true] %s1164_s2 }
  0x27   :  { %657 = vmatprep.subr.mxu1 %v249_v1  ;;  %v117_v4 = vld [vmem:[#allocation5 + $0x1c8] sm:$0xff]  ;;  %587 = vmatpush1.msra.mxu0 %v120_v2  ;;  %v116_v6 = vld [vmem:[#allocation5 + $0x1c0] sm:$0xff]  ;;  %s1247_s28 = scalar_lea.vmem %s1165_s2, 512  ;;  %p1252_p2 = scmp.lt.s32.totalorder %s1165_s2, %s1165_s2 }
  0x28   :  { %v245_v5 = vld [vmem:[#allocation5 + $0x5c8] sm:$0xff]  ;;  %658 = vmatpush1.msra.mxu1 %v248_v3  ;;  %v244_v7 = vld [vmem:[#allocation5 + $0x5c0] sm:$0xff]  ;;  %588 = vmatprep.subr.mxu0 %v117_v4  ;;  %p1248_p1 = scmp.ne.s32.totalorder %s1165_s2, %s1247_s28  ;;  %p1253_p3 = scmp.lt.s32.totalorder %s1247_s28, %s1247_s28 }
  0x29   :  { %v113_v8 = vld [vmem:[#allocation5 + $0x1a8] sm:$0xff]  ;;  %659 = vmatprep.subr.mxu1 %v245_v5  ;;  %v112_v10 = vld [vmem:[#allocation5 + $0x1a0] sm:$0xff]  ;;  %589 = vmatpush1.msra.mxu0 %v116_v6 }
  0x2a   :  { %v241_v9 = vld [vmem:[#allocation5 + $0x5a8] sm:$0xff]  ;;  %v240_v11 = vld [vmem:[#allocation5 + $0x5a0] sm:$0xff]  ;;  %660 = vmatpush1.msra.mxu1 %v244_v7  ;;  %590 = vmatprep.subr.mxu0 %v113_v8  ;;  %p1254_p4 = por %p1253_p3, %p1252_p2 }
  0x2b   :  { %v109_v12 = vld [vmem:[#allocation5 + $0x188] sm:$0xff]  ;;  %661 = vmatprep.subr.mxu1 %v241_v9  ;;  %v108_v14 = vld [vmem:[#allocation5 + $0x180] sm:$0xff]  ;;  %591 = vmatpush1.msra.mxu0 %v112_v10 }
  0x2c   :  { %v237_v13 = vld [vmem:[#allocation5 + $0x588] sm:$0xff]  ;;  %v236_v15 = vld [vmem:[#allocation5 + $0x580] sm:$0xff]  ;;  %662 = vmatpush1.msra.mxu1 %v240_v11  ;;  %592 = vmatprep.subr.mxu0 %v109_v12  ;;  %p1255_p5 = pnand %p1254_p4, %p1248_p1 }
  0x2d   :  { %v105_v16 = vld [vmem:[#allocation5 + $0x168] sm:$0xff]  ;;  %663 = vmatprep.subr.mxu1 %v237_v13  ;;  %v104_v18 = vld [vmem:[#allocation5 + $0x160] sm:$0xff]  ;;  %593 = vmatpush1.msra.mxu0 %v108_v14 }
  0x2e   :  { %v233_v17 = vld [vmem:[#allocation5 + $0x568] sm:$0xff]  ;;  %v232_v19 = vld [vmem:[#allocation5 + $0x560] sm:$0xff]  ;;  %664 = vmatpush1.msra.mxu1 %v236_v15  ;;  %594 = vmatprep.subr.mxu0 %v105_v16 }
  0x2f   :  { %v101_v20 = vld [vmem:[#allocation5 + $0x148] sm:$0xff]  ;;  %665 = vmatprep.subr.mxu1 %v233_v17  ;;  %v100_v22 = vld [vmem:[#allocation5 + $0x140] sm:$0xff]  ;;  %595 = vmatpush1.msra.mxu0 %v104_v18 }
  0x30   :  { %v229_v21 = vld [vmem:[#allocation5 + $0x548] sm:$0xff]  ;;  %v228_v23 = vld [vmem:[#allocation5 + $0x540] sm:$0xff]  ;;  %666 = vmatpush1.msra.mxu1 %v232_v19  ;;  %596 = vmatprep.subr.mxu0 %v101_v20 }
  0x31   :  { %v97_v24 = vld [vmem:[#allocation5 + $0x128] sm:$0xff]  ;;  %667 = vmatprep.subr.mxu1 %v229_v21  ;;  %v96_v26 = vld [vmem:[#allocation5 + $0x120] sm:$0xff]  ;;  %597 = vmatpush1.msra.mxu0 %v100_v22 }
  0x32   :  { %v225_v25 = vld [vmem:[#allocation5 + $0x528] sm:$0xff]  ;;  %v224_v27 = vld [vmem:[#allocation5 + $0x520] sm:$0xff]  ;;  %668 = vmatpush1.msra.mxu1 %v228_v23  ;;  %598 = vmatprep.subr.mxu0 %v97_v24 }
  0x33   :  { %v93_v28 = vld [vmem:[#allocation5 + $0x108] sm:$0xff]  ;;  %669 = vmatprep.subr.mxu1 %v225_v25  ;;  %v92_v30 = vld [vmem:[#allocation5 + $0x100] sm:$0xff]  ;;  %599 = vmatpush1.msra.mxu0 %v96_v26 }
  0x34   :  { %v221_v29 = vld [vmem:[#allocation5 + $0x508] sm:$0xff]  ;;  %v220_v31 = vld [vmem:[#allocation5 + $0x500] sm:$0xff]  ;;  %670 = vmatpush1.msra.mxu1 %v224_v27  ;;  %600 = vmatprep.subr.mxu0 %v93_v28 }
  0x35   :  { %v89_v32 = vld [vmem:[#allocation5 + $0xe8] sm:$0xff]  ;;  %671 = vmatprep.subr.mxu1 %v221_v29  ;;  %v88_v34 = vld [vmem:[#allocation5 + $0xe0] sm:$0xff]  ;;  %601 = vmatpush1.msra.mxu0 %v92_v30 }
  0x36   :  { %v217_v33 = vld [vmem:[#allocation5 + $0x4e8] sm:$0xff]  ;;  %v216_v35 = vld [vmem:[#allocation5 + $0x4e0] sm:$0xff]  ;;  %672 = vmatpush1.msra.mxu1 %v220_v31  ;;  %602 = vmatprep.subr.mxu0 %v89_v32 }
  0x37   :  { %v85_v36 = vld [vmem:[#allocation5 + $0xc8] sm:$0xff]  ;;  %673 = vmatprep.subr.mxu1 %v217_v33  ;;  %v84_v38 = vld [vmem:[#allocation5 + $0xc0] sm:$0xff]  ;;  %603 = vmatpush1.msra.mxu0 %v88_v34 }
  0x38   :  { %v213_v37 = vld [vmem:[#allocation5 + $0x4c8] sm:$0xff]  ;;  %v212_v39 = vld [vmem:[#allocation5 + $0x4c0] sm:$0xff]  ;;  %674 = vmatpush1.msra.mxu1 %v216_v35  ;;  %604 = vmatprep.subr.mxu0 %v85_v36 }
  0x39   :  { %v81_v40 = vld [vmem:[#allocation5 + $0xa8] sm:$0xff]  ;;  %675 = vmatprep.subr.mxu1 %v213_v37  ;;  %v80_v42 = vld [vmem:[#allocation5 + $0xa0] sm:$0xff]  ;;  %605 = vmatpush1.msra.mxu0 %v84_v38 }
  0x3a   :  { %v209_v41 = vld [vmem:[#allocation5 + $0x4a8] sm:$0xff]  ;;  %v208_v43 = vld [vmem:[#allocation5 + $0x4a0] sm:$0xff]  ;;  %676 = vmatpush1.msra.mxu1 %v212_v39  ;;  %606 = vmatprep.subr.mxu0 %v81_v40 }
  0x3b   :  { %v77_v44 = vld [vmem:[#allocation5 + $0x88] sm:$0xff]  ;;  %677 = vmatprep.subr.mxu1 %v209_v41  ;;  %v76_v46 = vld [vmem:[#allocation5 + $0x80] sm:$0xff]  ;;  %607 = vmatpush1.msra.mxu0 %v80_v42 }
  0x3c   :  { %v205_v45 = vld [vmem:[#allocation5 + $0x488] sm:$0xff]  ;;  %v204_v47 = vld [vmem:[#allocation5 + $0x480] sm:$0xff]  ;;  %678 = vmatpush1.msra.mxu1 %v208_v43  ;;  %608 = vmatprep.subr.mxu0 %v77_v44 }
  0x3d   :  { %v73_v48 = vld [vmem:[#allocation5 + $0x68] sm:$0xff]  ;;  %679 = vmatprep.subr.mxu1 %v205_v45  ;;  %v72_v50 = vld [vmem:[#allocation5 + $0x60] sm:$0xff]  ;;  %609 = vmatpush1.msra.mxu0 %v76_v46 }
  0x3e   :  { %v201_v49 = vld [vmem:[#allocation5 + $0x468] sm:$0xff]  ;;  %v200_v51 = vld [vmem:[#allocation5 + $0x460] sm:$0xff]  ;;  %680 = vmatpush1.msra.mxu1 %v204_v47  ;;  %610 = vmatprep.subr.mxu0 %v73_v48 }
  0x3f   :  { %v69_v52 = vld [vmem:[#allocation5 + $0x48] sm:$0xff]  ;;  %681 = vmatprep.subr.mxu1 %v201_v49  ;;  %v68_v54 = vld [vmem:[#allocation5 + $0x40] sm:$0xff]  ;;  %611 = vmatpush1.msra.mxu0 %v72_v50 }
  0x40   :  { %v197_v53 = vld [vmem:[#allocation5 + $0x448] sm:$0xff]  ;;  %v196_v55 = vld [vmem:[#allocation5 + $0x440] sm:$0xff]  ;;  %682 = vmatpush1.msra.mxu1 %v200_v51  ;;  %612 = vmatprep.subr.mxu0 %v69_v52 }
  0x41   :  { %v65_v56 = vld [vmem:[#allocation5 + $0x28] sm:$0xff]  ;;  %683 = vmatprep.subr.mxu1 %v197_v53  ;;  %v64_v58 = vld [vmem:[#allocation5 + $0x20] sm:$0xff]  ;;  %613 = vmatpush1.msra.mxu0 %v68_v54 }
  0x42   :  { %v193_v57 = vld [vmem:[#allocation5 + $0x428] sm:$0xff]  ;;  %v192_v59 = vld [vmem:[#allocation5 + $0x420] sm:$0xff]  ;;  %684 = vmatpush1.msra.mxu1 %v196_v55  ;;  %614 = vmatprep.subr.mxu0 %v65_v56 }
  0x43   :  { %v61_v60 = vld [vmem:[#allocation5 + $0x8] sm:$0xff]  ;;  %685 = vmatprep.subr.mxu1 %v193_v57  ;;  %v60_v62 = vld [vmem:[#allocation5] sm:$0xff]  ;;  %615 = vmatpush1.msra.mxu0 %v64_v58 }
  0x44   :  { %v189_v61 = vld [vmem:[#allocation5 + $0x408] sm:$0xff]  ;;  %v188_v63 = vld [vmem:[#allocation5 + $0x400] sm:$0xff]  ;;  %686 = vmatpush1.msra.mxu1 %v192_v59  ;;  %616 = vmatprep.subr.mxu0 %v61_v60 }
  0x45   :  { %v185_v0 = vld [vmem:[#allocation5 + $0x3e8] sm:$0xff]  ;;  %687 = vmatprep.subr.mxu1 %v189_v61  ;;  %v184_v2 = vld [vmem:[#allocation5 + $0x3e0] sm:$0xff]  ;;  %617 = vmatpush1.msra.mxu0 %v60_v62 }
  0x46   :  { %v313_v1 = vld [vmem:[#allocation5 + $0x7e8] sm:$0xff]  ;;  %v312_v3 = vld [vmem:[#allocation5 + $0x7e0] sm:$0xff]  ;;  %688 = vmatpush1.msra.mxu1 %v188_v63  ;;  %618 = vmatprep.subr.mxu0 %v185_v0 }
  0x47   :  { %v181_v4 = vld [vmem:[#allocation5 + $0x3c8] sm:$0xff]  ;;  %689 = vmatprep.subr.mxu1 %v313_v1  ;;  %v180_v6 = vld [vmem:[#allocation5 + $0x3c0] sm:$0xff]  ;;  %619 = vmatpush2.msra.mxu0 %v184_v2  ;;  %v55_v1 = vld [vmem:[#allocation2 + $0x18] sm:$0xff] }
  0x48   :  { %v309_v5 = vld [vmem:[#allocation5 + $0x7c8] sm:$0xff]  ;;  %v308_v7 = vld [vmem:[#allocation5 + $0x7c0] sm:$0xff]  ;;  %690 = vmatpush2.msra.mxu1 %v312_v3  ;;  %620 = vmatprep.subr.mxu0 %v181_v4  ;;  %v54_v3 = vld [vmem:[#allocation2 + $0x10] sm:$0xff] }
  0x49   :  { %v177_v8 = vld [vmem:[#allocation5 + $0x3a8] sm:$0xff]  ;;  %691 = vmatprep.subr.mxu1 %v309_v5  ;;  %v176_v10 = vld [vmem:[#allocation5 + $0x3a0] sm:$0xff]  ;;  %621 = vmatpush2.msra.mxu0 %v180_v6 }
  0x4a   :  { %v305_v9 = vld [vmem:[#allocation5 + $0x7a8] sm:$0xff]  ;;  %v304_v11 = vld [vmem:[#allocation5 + $0x7a0] sm:$0xff]  ;;  %692 = vmatpush2.msra.mxu1 %v308_v7  ;;  %622 = vmatprep.subr.mxu0 %v177_v8 }
  0x4b   :  { %v173_v12 = vld [vmem:[#allocation5 + $0x388] sm:$0xff]  ;;  %693 = vmatprep.subr.mxu1 %v305_v9  ;;  %v172_v14 = vld [vmem:[#allocation5 + $0x380] sm:$0xff]  ;;  %623 = vmatpush2.msra.mxu0 %v176_v10 }
  0x4c   :  { %v301_v13 = vld [vmem:[#allocation5 + $0x788] sm:$0xff]  ;;  %v300_v15 = vld [vmem:[#allocation5 + $0x780] sm:$0xff]  ;;  %694 = vmatpush2.msra.mxu1 %v304_v11  ;;  %624 = vmatprep.subr.mxu0 %v173_v12 }
  0x4d   :  { %v169_v16 = vld [vmem:[#allocation5 + $0x368] sm:$0xff]  ;;  %695 = vmatprep.subr.mxu1 %v301_v13  ;;  %v168_v18 = vld [vmem:[#allocation5 + $0x360] sm:$0xff]  ;;  %625 = vmatpush2.msra.mxu0 %v172_v14 }
  0x4e   :  { %v297_v17 = vld [vmem:[#allocation5 + $0x768] sm:$0xff]  ;;  %v296_v19 = vld [vmem:[#allocation5 + $0x760] sm:$0xff]  ;;  %696 = vmatpush2.msra.mxu1 %v300_v15  ;;  %626 = vmatprep.subr.mxu0 %v169_v16 }
  0x4f   :  { %v165_v20 = vld [vmem:[#allocation5 + $0x348] sm:$0xff]  ;;  %697 = vmatprep.subr.mxu1 %v297_v17  ;;  %v164_v22 = vld [vmem:[#allocation5 + $0x340] sm:$0xff]  ;;  %627 = vmatpush2.msra.mxu0 %v168_v18 }
  0x50   :  { %v293_v21 = vld [vmem:[#allocation5 + $0x748] sm:$0xff]  ;;  %v292_v23 = vld [vmem:[#allocation5 + $0x740] sm:$0xff]  ;;  %698 = vmatpush2.msra.mxu1 %v296_v19  ;;  %628 = vmatprep.subr.mxu0 %v165_v20 }
  0x51   :  { %v161_v24 = vld [vmem:[#allocation5 + $0x328] sm:$0xff]  ;;  %699 = vmatprep.subr.mxu1 %v293_v21  ;;  %v160_v26 = vld [vmem:[#allocation5 + $0x320] sm:$0xff]  ;;  %629 = vmatpush2.msra.mxu0 %v164_v22 }
  0x52   :  { %v289_v25 = vld [vmem:[#allocation5 + $0x728] sm:$0xff]  ;;  %v288_v27 = vld [vmem:[#allocation5 + $0x720] sm:$0xff]  ;;  %700 = vmatpush2.msra.mxu1 %v292_v23  ;;  %630 = vmatprep.subr.mxu0 %v161_v24 }
  0x53   :  { %v157_v28 = vld [vmem:[#allocation5 + $0x308] sm:$0xff]  ;;  %701 = vmatprep.subr.mxu1 %v289_v25  ;;  %v156_v30 = vld [vmem:[#allocation5 + $0x300] sm:$0xff]  ;;  %631 = vmatpush2.msra.mxu0 %v160_v26 }
  0x54   :  { %v285_v29 = vld [vmem:[#allocation5 + $0x708] sm:$0xff]  ;;  %v284_v31 = vld [vmem:[#allocation5 + $0x700] sm:$0xff]  ;;  %702 = vmatpush2.msra.mxu1 %v288_v27  ;;  %632 = vmatprep.subr.mxu0 %v157_v28 }
  0x55   :  { %v153_v32 = vld [vmem:[#allocation5 + $0x2e8] sm:$0xff]  ;;  %703 = vmatprep.subr.mxu1 %v285_v29  ;;  %v152_v34 = vld [vmem:[#allocation5 + $0x2e0] sm:$0xff]  ;;  %633 = vmatpush2.msra.mxu0 %v156_v30 }
  0x56   :  { %v281_v33 = vld [vmem:[#allocation5 + $0x6e8] sm:$0xff]  ;;  %v280_v35 = vld [vmem:[#allocation5 + $0x6e0] sm:$0xff]  ;;  %704 = vmatpush2.msra.mxu1 %v284_v31  ;;  %634 = vmatprep.subr.mxu0 %v153_v32 }
  0x57   :  { %v149_v36 = vld [vmem:[#allocation5 + $0x2c8] sm:$0xff]  ;;  %705 = vmatprep.subr.mxu1 %v281_v33  ;;  %v148_v38 = vld [vmem:[#allocation5 + $0x2c0] sm:$0xff]  ;;  %635 = vmatpush2.msra.mxu0 %v152_v34 }
  0x58   :  { %v277_v37 = vld [vmem:[#allocation5 + $0x6c8] sm:$0xff]  ;;  %v276_v39 = vld [vmem:[#allocation5 + $0x6c0] sm:$0xff]  ;;  %706 = vmatpush2.msra.mxu1 %v280_v35  ;;  %636 = vmatprep.subr.mxu0 %v149_v36 }
  0x59   :  { %v145_v40 = vld [vmem:[#allocation5 + $0x2a8] sm:$0xff]  ;;  %707 = vmatprep.subr.mxu1 %v277_v37  ;;  %v144_v42 = vld [vmem:[#allocation5 + $0x2a0] sm:$0xff]  ;;  %637 = vmatpush2.msra.mxu0 %v148_v38 }
  0x5a   :  { %v273_v41 = vld [vmem:[#allocation5 + $0x6a8] sm:$0xff]  ;;  %v272_v43 = vld [vmem:[#allocation5 + $0x6a0] sm:$0xff]  ;;  %708 = vmatpush2.msra.mxu1 %v276_v39  ;;  %638 = vmatprep.subr.mxu0 %v145_v40 }
  0x5b   :  { %v141_v44 = vld [vmem:[#allocation5 + $0x288] sm:$0xff]  ;;  %709 = vmatprep.subr.mxu1 %v273_v41  ;;  %v140_v46 = vld [vmem:[#allocation5 + $0x280] sm:$0xff]  ;;  %639 = vmatpush2.msra.mxu0 %v144_v42 }
  0x5c   :  { %v269_v45 = vld [vmem:[#allocation5 + $0x688] sm:$0xff]  ;;  %v268_v47 = vld [vmem:[#allocation5 + $0x680] sm:$0xff]  ;;  %710 = vmatpush2.msra.mxu1 %v272_v43  ;;  %640 = vmatprep.subr.mxu0 %v141_v44 }
  0x5d   :  { %v137_v48 = vld [vmem:[#allocation5 + $0x268] sm:$0xff]  ;;  %711 = vmatprep.subr.mxu1 %v269_v45  ;;  %v136_v50 = vld [vmem:[#allocation5 + $0x260] sm:$0xff]  ;;  %641 = vmatpush2.msra.mxu0 %v140_v46 }
  0x5e   :  { %v265_v49 = vld [vmem:[#allocation5 + $0x668] sm:$0xff]  ;;  %v264_v51 = vld [vmem:[#allocation5 + $0x660] sm:$0xff]  ;;  %712 = vmatpush2.msra.mxu1 %v268_v47  ;;  %642 = vmatprep.subr.mxu0 %v137_v48 }
  0x5f   :  { %v133_v52 = vld [vmem:[#allocation5 + $0x248] sm:$0xff]  ;;  %713 = vmatprep.subr.mxu1 %v265_v49  ;;  %v132_v54 = vld [vmem:[#allocation5 + $0x240] sm:$0xff]  ;;  %643 = vmatpush2.msra.mxu0 %v136_v50 }
  0x60   :  { %v261_v53 = vld [vmem:[#allocation5 + $0x648] sm:$0xff]  ;;  %v260_v55 = vld [vmem:[#allocation5 + $0x640] sm:$0xff]  ;;  %714 = vmatpush2.msra.mxu1 %v264_v51  ;;  %644 = vmatprep.subr.mxu0 %v133_v52 }
  0x61   :  { %v129_v56 = vld [vmem:[#allocation5 + $0x228] sm:$0xff]  ;;  %715 = vmatprep.subr.mxu1 %v261_v53  ;;  %v128_v58 = vld [vmem:[#allocation5 + $0x220] sm:$0xff]  ;;  %645 = vmatpush2.msra.mxu0 %v132_v54 }
  0x62   :  { %v257_v57 = vld [vmem:[#allocation5 + $0x628] sm:$0xff]  ;;  %v256_v59 = vld [vmem:[#allocation5 + $0x620] sm:$0xff]  ;;  %716 = vmatpush2.msra.mxu1 %v260_v55  ;;  %646 = vmatprep.subr.mxu0 %v129_v56 }
  0x63   :  { %v125_v60 = vld [vmem:[#allocation5 + $0x208] sm:$0xff]  ;;  %717 = vmatprep.subr.mxu1 %v257_v57  ;;  %v124_v62 = vld [vmem:[#allocation5 + $0x200] sm:$0xff]  ;;  %647 = vmatpush2.msra.mxu0 %v128_v58 }
  0x64   :  { %v253_v61 = vld [vmem:[#allocation5 + $0x608] sm:$0xff]  ;;  %718 = vmatpush2.msra.mxu1 %v256_v59  ;;  %v252_v0 = vld [vmem:[#allocation5 + $0x600] sm:$0xff]  ;;  %648 = vmatprep.subr.mxu0 %v125_v60 }
  0x65   :  { %v53_v63 = vld [vmem:[#allocation2 + $0x8] sm:$0xff]  ;;  %719 = vmatprep.subr.mxu1 %v253_v61  ;;  %v1308_v2 = vld [vmem:[#allocation2] sm:$0xff]  ;;  %649 = vmatpush2.msra.mxu0 %v124_v62 }
  0x66   :  { %650 = vmatprep.mubr.f32.mxu0 %v53_v63  ;;  %v377_v4 = vld [vmem:[#allocation5 + $0x9e8] sm:$0xff]  ;;  %720 = vmatpush2.msra.mxu1 %v252_v0  ;;  %v376_v6 = vld [vmem:[#allocation5 + $0x9e0] sm:$0xff] }
  0x67   :  { %v505_v5 = vld [vmem:[#allocation5 + $0xde8] sm:$0xff]  ;;  %721 = vmatprep.mubr.f32.mxu1 %v55_v1  ;;  %v504_v7 = vld [vmem:[#allocation5 + $0xde0] sm:$0xff]  ;;  %651 = vmatmul.mubr.f32.vlgmr.msra.gmra.mxu0 %v1308_v2 }
  0x68   :  { %722 = vmatmul.mubr.f32.vlgmr.msra.gmra.mxu1 %v54_v3  ;;  %v373_v8 = vld [vmem:[#allocation5 + $0x9c8] sm:$0xff]  ;;  %728 = vmatprep.subr.mxu0 %v377_v4  ;;  %v372_v10 = vld [vmem:[#allocation5 + $0x9c0] sm:$0xff] }
  0x69   :  { %v501_v9 = vld [vmem:[#allocation5 + $0xdc8] sm:$0xff]  ;;  %799 = vmatprep.subr.mxu1 %v505_v5  ;;  %v500_v11 = vld [vmem:[#allocation5 + $0xdc0] sm:$0xff]  ;;  %729 = vmatpush1.msra.mxu0 %v376_v6 }
  0x6a   :  { %800 = vmatpush1.msra.mxu1 %v504_v7  ;;  %v369_v12 = vld [vmem:[#allocation5 + $0x9a8] sm:$0xff]  ;;  %730 = vmatprep.subr.mxu0 %v373_v8  ;;  %v368_v14 = vld [vmem:[#allocation5 + $0x9a0] sm:$0xff] }
  0x6b   :  { %v497_v13 = vld [vmem:[#allocation5 + $0xda8] sm:$0xff]  ;;  %801 = vmatprep.subr.mxu1 %v501_v9  ;;  %v496_v15 = vld [vmem:[#allocation5 + $0xda0] sm:$0xff]  ;;  %731 = vmatpush1.msra.mxu0 %v372_v10 }
  0x6c   :  { %802 = vmatpush1.msra.mxu1 %v500_v11  ;;  %v365_v16 = vld [vmem:[#allocation5 + $0x988] sm:$0xff]  ;;  %732 = vmatprep.subr.mxu0 %v369_v12  ;;  %v364_v18 = vld [vmem:[#allocation5 + $0x980] sm:$0xff] }
  0x6d   :  { %v493_v17 = vld [vmem:[#allocation5 + $0xd88] sm:$0xff]  ;;  %803 = vmatprep.subr.mxu1 %v497_v13  ;;  %v492_v19 = vld [vmem:[#allocation5 + $0xd80] sm:$0xff]  ;;  %733 = vmatpush1.msra.mxu0 %v368_v14 }
  0x6e   :  { %804 = vmatpush1.msra.mxu1 %v496_v15  ;;  %v361_v20 = vld [vmem:[#allocation5 + $0x968] sm:$0xff]  ;;  %734 = vmatprep.subr.mxu0 %v365_v16  ;;  %v360_v22 = vld [vmem:[#allocation5 + $0x960] sm:$0xff] }
  0x6f   :  { %v489_v21 = vld [vmem:[#allocation5 + $0xd68] sm:$0xff]  ;;  %805 = vmatprep.subr.mxu1 %v493_v17  ;;  %v488_v23 = vld [vmem:[#allocation5 + $0xd60] sm:$0xff]  ;;  %735 = vmatpush1.msra.mxu0 %v364_v18 }
  0x70   :  { %806 = vmatpush1.msra.mxu1 %v492_v19  ;;  %v357_v24 = vld [vmem:[#allocation5 + $0x948] sm:$0xff]  ;;  %736 = vmatprep.subr.mxu0 %v361_v20  ;;  %v356_v26 = vld [vmem:[#allocation5 + $0x940] sm:$0xff] }
  0x71   :  { %v485_v25 = vld [vmem:[#allocation5 + $0xd48] sm:$0xff]  ;;  %807 = vmatprep.subr.mxu1 %v489_v21  ;;  %v484_v27 = vld [vmem:[#allocation5 + $0xd40] sm:$0xff]  ;;  %737 = vmatpush1.msra.mxu0 %v360_v22 }
  0x72   :  { %808 = vmatpush1.msra.mxu1 %v488_v23  ;;  %v353_v28 = vld [vmem:[#allocation5 + $0x928] sm:$0xff]  ;;  %738 = vmatprep.subr.mxu0 %v357_v24  ;;  %v352_v30 = vld [vmem:[#allocation5 + $0x920] sm:$0xff] }
  0x73   :  { %v481_v29 = vld [vmem:[#allocation5 + $0xd28] sm:$0xff]  ;;  %809 = vmatprep.subr.mxu1 %v485_v25  ;;  %v480_v31 = vld [vmem:[#allocation5 + $0xd20] sm:$0xff]  ;;  %739 = vmatpush1.msra.mxu0 %v356_v26 }
  0x74   :  { %810 = vmatpush1.msra.mxu1 %v484_v27  ;;  %v349_v32 = vld [vmem:[#allocation5 + $0x908] sm:$0xff]  ;;  %740 = vmatprep.subr.mxu0 %v353_v28  ;;  %v348_v34 = vld [vmem:[#allocation5 + $0x900] sm:$0xff] }
  0x75   :  { %v477_v33 = vld [vmem:[#allocation5 + $0xd08] sm:$0xff]  ;;  %811 = vmatprep.subr.mxu1 %v481_v29  ;;  %v476_v35 = vld [vmem:[#allocation5 + $0xd00] sm:$0xff]  ;;  %741 = vmatpush1.msra.mxu0 %v352_v30 }
  0x76   :  { %812 = vmatpush1.msra.mxu1 %v480_v31  ;;  %v345_v36 = vld [vmem:[#allocation5 + $0x8e8] sm:$0xff]  ;;  %742 = vmatprep.subr.mxu0 %v349_v32  ;;  %v344_v38 = vld [vmem:[#allocation5 + $0x8e0] sm:$0xff] }
  0x77   :  { %v473_v37 = vld [vmem:[#allocation5 + $0xce8] sm:$0xff]  ;;  %813 = vmatprep.subr.mxu1 %v477_v33  ;;  %v472_v39 = vld [vmem:[#allocation5 + $0xce0] sm:$0xff]  ;;  %743 = vmatpush1.msra.mxu0 %v348_v34 }
  0x78   :  { %814 = vmatpush1.msra.mxu1 %v476_v35  ;;  %v341_v40 = vld [vmem:[#allocation5 + $0x8c8] sm:$0xff]  ;;  %744 = vmatprep.subr.mxu0 %v345_v36  ;;  %v340_v42 = vld [vmem:[#allocation5 + $0x8c0] sm:$0xff] }
  0x79   :  { %v469_v41 = vld [vmem:[#allocation5 + $0xcc8] sm:$0xff]  ;;  %815 = vmatprep.subr.mxu1 %v473_v37  ;;  %v468_v43 = vld [vmem:[#allocation5 + $0xcc0] sm:$0xff]  ;;  %745 = vmatpush1.msra.mxu0 %v344_v38 }
  0x7a   :  { %816 = vmatpush1.msra.mxu1 %v472_v39  ;;  %v337_v44 = vld [vmem:[#allocation5 + $0x8a8] sm:$0xff]  ;;  %746 = vmatprep.subr.mxu0 %v341_v40  ;;  %v336_v46 = vld [vmem:[#allocation5 + $0x8a0] sm:$0xff] }
  0x7b   :  { %v465_v45 = vld [vmem:[#allocation5 + $0xca8] sm:$0xff]  ;;  %817 = vmatprep.subr.mxu1 %v469_v41  ;;  %v464_v47 = vld [vmem:[#allocation5 + $0xca0] sm:$0xff]  ;;  %747 = vmatpush1.msra.mxu0 %v340_v42 }
  0x7c   :  { %818 = vmatpush1.msra.mxu1 %v468_v43  ;;  %v333_v48 = vld [vmem:[#allocation5 + $0x888] sm:$0xff]  ;;  %748 = vmatprep.subr.mxu0 %v337_v44  ;;  %v332_v50 = vld [vmem:[#allocation5 + $0x880] sm:$0xff] }
  0x7d   :  { %v461_v49 = vld [vmem:[#allocation5 + $0xc88] sm:$0xff]  ;;  %819 = vmatprep.subr.mxu1 %v465_v45  ;;  %v460_v51 = vld [vmem:[#allocation5 + $0xc80] sm:$0xff]  ;;  %749 = vmatpush1.msra.mxu0 %v336_v46 }
  0x7e   :  { %820 = vmatpush1.msra.mxu1 %v464_v47  ;;  %v329_v52 = vld [vmem:[#allocation5 + $0x868] sm:$0xff]  ;;  %750 = vmatprep.subr.mxu0 %v333_v48  ;;  %v328_v54 = vld [vmem:[#allocation5 + $0x860] sm:$0xff] }
  0x7f   :  { %v457_v53 = vld [vmem:[#allocation5 + $0xc68] sm:$0xff]  ;;  %821 = vmatprep.subr.mxu1 %v461_v49  ;;  %v456_v55 = vld [vmem:[#allocation5 + $0xc60] sm:$0xff]  ;;  %751 = vmatpush1.msra.mxu0 %v332_v50 }
  0x80   :  { %822 = vmatpush1.msra.mxu1 %v460_v51  ;;  %v325_v56 = vld [vmem:[#allocation5 + $0x848] sm:$0xff]  ;;  %752 = vmatprep.subr.mxu0 %v329_v52  ;;  %v324_v58 = vld [vmem:[#allocation5 + $0x840] sm:$0xff] }
  0x81   :  { %v453_v57 = vld [vmem:[#allocation5 + $0xc48] sm:$0xff]  ;;  %823 = vmatprep.subr.mxu1 %v457_v53  ;;  %v452_v59 = vld [vmem:[#allocation5 + $0xc40] sm:$0xff]  ;;  %753 = vmatpush1.msra.mxu0 %v328_v54 }
  0x82   :  { %824 = vmatpush1.msra.mxu1 %v456_v55  ;;  %v321_v60 = vld [vmem:[#allocation5 + $0x828] sm:$0xff]  ;;  %754 = vmatprep.subr.mxu0 %v325_v56  ;;  %v320_v62 = vld [vmem:[#allocation5 + $0x820] sm:$0xff] }
  0x83   :  { %v449_v61 = vld [vmem:[#allocation5 + $0xc28] sm:$0xff]  ;;  %825 = vmatprep.subr.mxu1 %v453_v57  ;;  %v448_v63 = vld [vmem:[#allocation5 + $0xc20] sm:$0xff]  ;;  %755 = vmatpush1.msra.mxu0 %v324_v58  ;;  %v59_v57 = vld [vmem:[#allocation2 + $0x38] sm:$0xff] }
  0x84   :  { %826 = vmatpush1.msra.mxu1 %v452_v59  ;;  %v317_v0 = vld [vmem:[#allocation5 + $0x808] sm:$0xff]  ;;  %756 = vmatprep.subr.mxu0 %v321_v60  ;;  %v316_v3 = vld [vmem:[#allocation5 + $0x800] sm:$0xff]  ;;  %v58_v59 = vld [vmem:[#allocation2 + $0x30] sm:$0xff] }
  0x85   :  { %v445_v1 = vld [vmem:[#allocation5 + $0xc08] sm:$0xff]  ;;  %827 = vmatprep.subr.mxu1 %v449_v61  ;;  %v444_v4 = vld [vmem:[#allocation5 + $0xc00] sm:$0xff]  ;;  %757 = vmatpush1.msra.mxu0 %v320_v62  ;;  %v123_v60 = vld [vmem:[#allocation5 + $0x1f8] sm:$0xff] }
  0x86   :  { %828 = vmatpush1.msra.mxu1 %v448_v63  ;;  %v441_v5 = vld [vmem:[#allocation5 + $0xbe8] sm:$0xff]  ;;  %758 = vmatprep.subr.mxu0 %v317_v0  ;;  %v440_v7 = vld [vmem:[#allocation5 + $0xbe0] sm:$0xff]  ;;  %v122_v62 = vld [vmem:[#allocation5 + $0x1f0] sm:$0xff] }
  0x87   :  { %v557_v6 = vld [vmem:[#allocation5 + $0xf88] sm:$0xff]  ;;  %829 = vmatprep.subr.mxu1 %v445_v1  ;;  %v556_v8 = vld [vmem:[#allocation5 + $0xf80] sm:$0xff]  ;;  %759 = vmatpush1.msra.mxu0 %v316_v3  ;;  %v119_v0 = vld [vmem:[#allocation5 + $0x1d8] sm:$0xff] }
  0x88   :  { %830 = vmatpush1.msra.mxu1 %v444_v4  ;;  %v437_v9 = vld [vmem:[#allocation5 + $0xbc8] sm:$0xff]  ;;  %760 = vmatprep.subr.mxu0 %v441_v5  ;;  %v436_v11 = vld [vmem:[#allocation5 + $0xbc0] sm:$0xff]  ;;  %v118_v3 = vld [vmem:[#allocation5 + $0x1d0] sm:$0xff] }
  0x89   :  { %v553_v10 = vld [vmem:[#allocation5 + $0xf68] sm:$0xff]  ;;  %837 = vmatprep.subr.mxu1 %v557_v6  ;;  %v552_v12 = vld [vmem:[#allocation5 + $0xf60] sm:$0xff]  ;;  %761 = vmatpush2.msra.mxu0 %v440_v7  ;;  %v115_v5 = vld [vmem:[#allocation5 + $0x1b8] sm:$0xff] }
  0x8a   :  { %838 = vmatpush2.msra.mxu1 %v556_v8  ;;  %v433_v13 = vld [vmem:[#allocation5 + $0xba8] sm:$0xff]  ;;  %762 = vmatprep.subr.mxu0 %v437_v9  ;;  %v432_v15 = vld [vmem:[#allocation5 + $0xba0] sm:$0xff]  ;;  %v114_v8 = vld [vmem:[#allocation5 + $0x1b0] sm:$0xff] }
  0x8b   :  { %v549_v14 = vld [vmem:[#allocation5 + $0xf48] sm:$0xff]  ;;  %839 = vmatprep.subr.mxu1 %v553_v10  ;;  %v548_v16 = vld [vmem:[#allocation5 + $0xf40] sm:$0xff]  ;;  %763 = vmatpush2.msra.mxu0 %v436_v11  ;;  %v111_v10 = vld [vmem:[#allocation5 + $0x198] sm:$0xff] }
  0x8c   :  { %840 = vmatpush2.msra.mxu1 %v552_v12  ;;  %v429_v17 = vld [vmem:[#allocation5 + $0xb88] sm:$0xff]  ;;  %764 = vmatprep.subr.mxu0 %v433_v13  ;;  %v428_v19 = vld [vmem:[#allocation5 + $0xb80] sm:$0xff]  ;;  %v251_v11 = vld [vmem:[#allocation5 + $0x5f8] sm:$0xff] }
  0x8d   :  { %v545_v18 = vld [vmem:[#allocation5 + $0xf28] sm:$0xff]  ;;  %841 = vmatprep.subr.mxu1 %v549_v14  ;;  %v544_v20 = vld [vmem:[#allocation5 + $0xf20] sm:$0xff]  ;;  %765 = vmatpush2.msra.mxu0 %v432_v15  ;;  %v110_v12 = vld [vmem:[#allocation5 + $0x190] sm:$0xff] }
  0x8e   :  { %842 = vmatpush2.msra.mxu1 %v548_v16  ;;  %v425_v21 = vld [vmem:[#allocation5 + $0xb68] sm:$0xff]  ;;  %766 = vmatprep.subr.mxu0 %v429_v17  ;;  %v424_v23 = vld [vmem:[#allocation5 + $0xb60] sm:$0xff]  ;;  %v250_v13 = vld [vmem:[#allocation5 + $0x5f0] sm:$0xff] }
  0x8f   :  { %v541_v22 = vld [vmem:[#allocation5 + $0xf08] sm:$0xff]  ;;  %843 = vmatprep.subr.mxu1 %v545_v18  ;;  %v540_v24 = vld [vmem:[#allocation5 + $0xf00] sm:$0xff]  ;;  %767 = vmatpush2.msra.mxu0 %v428_v19  ;;  %v107_v14 = vld [vmem:[#allocation5 + $0x178] sm:$0xff] }
  0x90   :  { %844 = vmatpush2.msra.mxu1 %v544_v20  ;;  %v421_v25 = vld [vmem:[#allocation5 + $0xb48] sm:$0xff]  ;;  %768 = vmatprep.subr.mxu0 %v425_v21  ;;  %v420_v27 = vld [vmem:[#allocation5 + $0xb40] sm:$0xff]  ;;  %v247_v15 = vld [vmem:[#allocation5 + $0x5d8] sm:$0xff] }
  0x91   :  { %v537_v26 = vld [vmem:[#allocation5 + $0xee8] sm:$0xff]  ;;  %845 = vmatprep.subr.mxu1 %v541_v22  ;;  %v536_v28 = vld [vmem:[#allocation5 + $0xee0] sm:$0xff]  ;;  %769 = vmatpush2.msra.mxu0 %v424_v23  ;;  %v106_v16 = vld [vmem:[#allocation5 + $0x170] sm:$0xff] }
  0x92   :  { %846 = vmatpush2.msra.mxu1 %v540_v24  ;;  %v417_v29 = vld [vmem:[#allocation5 + $0xb28] sm:$0xff]  ;;  %770 = vmatprep.subr.mxu0 %v421_v25  ;;  %v416_v31 = vld [vmem:[#allocation5 + $0xb20] sm:$0xff]  ;;  %v246_v17 = vld [vmem:[#allocation5 + $0x5d0] sm:$0xff] }
  0x93   :  { %v533_v30 = vld [vmem:[#allocation5 + $0xec8] sm:$0xff]  ;;  %847 = vmatprep.subr.mxu1 %v537_v26  ;;  %v532_v32 = vld [vmem:[#allocation5 + $0xec0] sm:$0xff]  ;;  %771 = vmatpush2.msra.mxu0 %v420_v27  ;;  %v103_v18 = vld [vmem:[#allocation5 + $0x158] sm:$0xff] }
  0x94   :  { %848 = vmatpush2.msra.mxu1 %v536_v28  ;;  %v413_v33 = vld [vmem:[#allocation5 + $0xb08] sm:$0xff]  ;;  %772 = vmatprep.subr.mxu0 %v417_v29  ;;  %v412_v35 = vld [vmem:[#allocation5 + $0xb00] sm:$0xff]  ;;  %v243_v19 = vld [vmem:[#allocation5 + $0x5b8] sm:$0xff] }
  0x95   :  { %v529_v34 = vld [vmem:[#allocation5 + $0xea8] sm:$0xff]  ;;  %849 = vmatprep.subr.mxu1 %v533_v30  ;;  %v528_v36 = vld [vmem:[#allocation5 + $0xea0] sm:$0xff]  ;;  %773 = vmatpush2.msra.mxu0 %v416_v31  ;;  %v102_v20 = vld [vmem:[#allocation5 + $0x150] sm:$0xff] }
  0x96   :  { %850 = vmatpush2.msra.mxu1 %v532_v32  ;;  %v409_v37 = vld [vmem:[#allocation5 + $0xae8] sm:$0xff]  ;;  %774 = vmatprep.subr.mxu0 %v413_v33  ;;  %v408_v39 = vld [vmem:[#allocation5 + $0xae0] sm:$0xff]  ;;  %v242_v21 = vld [vmem:[#allocation5 + $0x5b0] sm:$0xff] }
  0x97   :  { %v525_v38 = vld [vmem:[#allocation5 + $0xe88] sm:$0xff]  ;;  %851 = vmatprep.subr.mxu1 %v529_v34  ;;  %v524_v40 = vld [vmem:[#allocation5 + $0xe80] sm:$0xff]  ;;  %775 = vmatpush2.msra.mxu0 %v412_v35  ;;  %v99_v22 = vld [vmem:[#allocation5 + $0x138] sm:$0xff] }
  0x98   :  { %852 = vmatpush2.msra.mxu1 %v528_v36  ;;  %v405_v41 = vld [vmem:[#allocation5 + $0xac8] sm:$0xff]  ;;  %776 = vmatprep.subr.mxu0 %v409_v37  ;;  %v404_v43 = vld [vmem:[#allocation5 + $0xac0] sm:$0xff]  ;;  %v239_v23 = vld [vmem:[#allocation5 + $0x598] sm:$0xff] }
  0x99   :  { %v521_v42 = vld [vmem:[#allocation5 + $0xe68] sm:$0xff]  ;;  %853 = vmatprep.subr.mxu1 %v525_v38  ;;  %v520_v44 = vld [vmem:[#allocation5 + $0xe60] sm:$0xff]  ;;  %777 = vmatpush2.msra.mxu0 %v408_v39  ;;  %v98_v24 = vld [vmem:[#allocation5 + $0x130] sm:$0xff] }
  0x9a   :  { %854 = vmatpush2.msra.mxu1 %v524_v40  ;;  %v401_v45 = vld [vmem:[#allocation5 + $0xaa8] sm:$0xff]  ;;  %778 = vmatprep.subr.mxu0 %v405_v41  ;;  %v400_v47 = vld [vmem:[#allocation5 + $0xaa0] sm:$0xff]  ;;  %v238_v25 = vld [vmem:[#allocation5 + $0x590] sm:$0xff] }
  0x9b   :  { %v517_v46 = vld [vmem:[#allocation5 + $0xe48] sm:$0xff]  ;;  %855 = vmatprep.subr.mxu1 %v521_v42  ;;  %v516_v48 = vld [vmem:[#allocation5 + $0xe40] sm:$0xff]  ;;  %779 = vmatpush2.msra.mxu0 %v404_v43  ;;  %v95_v26 = vld [vmem:[#allocation5 + $0x118] sm:$0xff] }
  0x9c   :  { %856 = vmatpush2.msra.mxu1 %v520_v44  ;;  %v397_v49 = vld [vmem:[#allocation5 + $0xa88] sm:$0xff]  ;;  %780 = vmatprep.subr.mxu0 %v401_v45  ;;  %v396_v51 = vld [vmem:[#allocation5 + $0xa80] sm:$0xff]  ;;  %v235_v27 = vld [vmem:[#allocation5 + $0x578] sm:$0xff] }
  0x9d   :  { %v513_v50 = vld [vmem:[#allocation5 + $0xe28] sm:$0xff]  ;;  %857 = vmatprep.subr.mxu1 %v517_v46  ;;  %v512_v52 = vld [vmem:[#allocation5 + $0xe20] sm:$0xff]  ;;  %781 = vmatpush2.msra.mxu0 %v400_v47  ;;  %v94_v28 = vld [vmem:[#allocation5 + $0x110] sm:$0xff] }
  0x9e   :  { %858 = vmatpush2.msra.mxu1 %v516_v48  ;;  %v393_v53 = vld [vmem:[#allocation5 + $0xa68] sm:$0xff]  ;;  %782 = vmatprep.subr.mxu0 %v397_v49  ;;  %v392_v55 = vld [vmem:[#allocation5 + $0xa60] sm:$0xff]  ;;  %v234_v29 = vld [vmem:[#allocation5 + $0x570] sm:$0xff] }
  0x9f   :  { %v509_v54 = vld [vmem:[#allocation5 + $0xe08] sm:$0xff]  ;;  %859 = vmatprep.subr.mxu1 %v513_v50  ;;  %v508_v56 = vld [vmem:[#allocation5 + $0xe00] sm:$0xff]  ;;  %783 = vmatpush2.msra.mxu0 %v396_v51  ;;  %v91_v30 = vld [vmem:[#allocation5 + $0xf8] sm:$0xff] }
  0xa0   :  { %860 = vmatpush2.msra.mxu1 %v512_v52  ;;  %v389_v58 = vld [vmem:[#allocation5 + $0xa48] sm:$0xff]  ;;  %784 = vmatprep.subr.mxu0 %v393_v53  ;;  %v388_v61 = vld [vmem:[#allocation5 + $0xa40] sm:$0xff]  ;;  %v231_v31 = vld [vmem:[#allocation5 + $0x558] sm:$0xff] }
  0xa1   :  { %861 = vmatprep.subr.mxu1 %v509_v54  ;;  %785 = vmatpush2.msra.mxu0 %v392_v55  ;;  %v385_v63 = vld [vmem:[#allocation5 + $0xa28] sm:$0xff]  ;;  %v384_v1 = vld [vmem:[#allocation5 + $0xa20] sm:$0xff]  ;;  %v90_v32 = vld [vmem:[#allocation5 + $0xf0] sm:$0xff] }
  0xa2   :  { %862 = vmatpush2.msra.mxu1 %v508_v56  ;;  %1174 = vmatprep.mubr.msk.f32.mxu1 %vm582_vm0, %v59_v57  ;;  %v381_v4 = vld [vmem:[#allocation5 + $0xa08] sm:$0xff]  ;;  %v380_v6 = vld [vmem:[#allocation5 + $0xa00] sm:$0xff]  ;;  %v230_v33 = vld [vmem:[#allocation5 + $0x550] sm:$0xff] }
  0xa3   :  { %786 = vmatprep.subr.mxu0 %v389_v58  ;;  %864 = vmatmul.mubr.f32.vlgmr.msra.gmra.mxu1 %v58_v59  ;;  %v1312_v7 = vld [vmem:[#allocation2 + $0x28] sm:$0xff]  ;;  %v1314_v9 = vld [vmem:[#allocation2 + $0x20] sm:$0xff]  ;;  %v87_v34 = vld [vmem:[#allocation5 + $0xd8] sm:$0xff] }
  0xa4   :  { %870 = vmatprep.subr.mxu1 %v123_v60  ;;  %787 = vmatpush2.msra.mxu0 %v388_v61  ;;  %v227_v35 = vld [vmem:[#allocation5 + $0x538] sm:$0xff]  ;;  %v86_v36 = vld [vmem:[#allocation5 + $0xd0] sm:$0xff] }
  0xa5   :  { %871 = vmatpush1.msra.mxu1 %v122_v62  ;;  %788 = vmatprep.subr.mxu0 %v385_v63  ;;  %v226_v37 = vld [vmem:[#allocation5 + $0x530] sm:$0xff]  ;;  %v83_v38 = vld [vmem:[#allocation5 + $0xb8] sm:$0xff] }
  0xa6   :  { %872 = vmatprep.subr.mxu1 %v119_v0  ;;  %789 = vmatpush2.msra.mxu0 %v384_v1  ;;  %v223_v39 = vld [vmem:[#allocation5 + $0x518] sm:$0xff]  ;;  %v82_v40 = vld [vmem:[#allocation5 + $0xb0] sm:$0xff] }
  0xa7   :  { %873 = vmatpush1.msra.mxu1 %v118_v3  ;;  %790 = vmatprep.subr.mxu0 %v381_v4  ;;  %v222_v41 = vld [vmem:[#allocation5 + $0x510] sm:$0xff]  ;;  %v79_v42 = vld [vmem:[#allocation5 + $0x98] sm:$0xff] }
  0xa8   :  { %874 = vmatprep.subr.mxu1 %v115_v5  ;;  %791 = vmatpush2.msra.mxu0 %v380_v6  ;;  %v219_v43 = vld [vmem:[#allocation5 + $0x4f8] sm:$0xff]  ;;  %v78_v44 = vld [vmem:[#allocation5 + $0x90] sm:$0xff] }
  0xa9   :  { %792 = vmatprep.mubr.f32.mxu0 %v1312_v7  ;;  %875 = vmatpush1.msra.mxu1 %v114_v8  ;;  %v218_v45 = vld [vmem:[#allocation5 + $0x4f0] sm:$0xff]  ;;  %v75_v46 = vld [vmem:[#allocation5 + $0x78] sm:$0xff] }
  0xaa   :  { %793 = vmatmul.mubr.f32.vlgmr.msra.gmra.mxu0 %v1314_v9  ;;  %876 = vmatprep.subr.mxu1 %v111_v10  ;;  %v215_v47 = vld [vmem:[#allocation5 + $0x4d8] sm:$0xff]  ;;  %v74_v48 = vld [vmem:[#allocation5 + $0x70] sm:$0xff] }
  0xab   :  { %941 = vmatprep.subr.mxu0 %v251_v11  ;;  %877 = vmatpush1.msra.mxu1 %v110_v12  ;;  %v214_v49 = vld [vmem:[#allocation5 + $0x4d0] sm:$0xff]  ;;  %v71_v50 = vld [vmem:[#allocation5 + $0x58] sm:$0xff] }
  0xac   :  { %942 = vmatpush1.msra.mxu0 %v250_v13  ;;  %878 = vmatprep.subr.mxu1 %v107_v14  ;;  %v211_v51 = vld [vmem:[#allocation5 + $0x4b8] sm:$0xff]  ;;  %v70_v52 = vld [vmem:[#allocation5 + $0x50] sm:$0xff] }
  0xad   :  { %943 = vmatprep.subr.mxu0 %v247_v15  ;;  %879 = vmatpush1.msra.mxu1 %v106_v16  ;;  %v210_v53 = vld [vmem:[#allocation5 + $0x4b0] sm:$0xff]  ;;  %v67_v54 = vld [vmem:[#allocation5 + $0x38] sm:$0xff] }
  0xae   :  { %944 = vmatpush1.msra.mxu0 %v246_v17  ;;  %880 = vmatprep.subr.mxu1 %v103_v18  ;;  %v207_v55 = vld [vmem:[#allocation5 + $0x498] sm:$0xff]  ;;  %v66_v56 = vld [vmem:[#allocation5 + $0x30] sm:$0xff] }
  0xaf   :  { %945 = vmatprep.subr.mxu0 %v243_v19  ;;  %881 = vmatpush1.msra.mxu1 %v102_v20  ;;  %v206_v57 = vld [vmem:[#allocation5 + $0x490] sm:$0xff]  ;;  %v63_v58 = vld [vmem:[#allocation5 + $0x18] sm:$0xff] }
  0xb0   :  { %946 = vmatpush1.msra.mxu0 %v242_v21  ;;  %882 = vmatprep.subr.mxu1 %v99_v22  ;;  %v203_v59 = vld [vmem:[#allocation5 + $0x478] sm:$0xff]  ;;  %v62_v60 = vld [vmem:[#allocation5 + $0x10] sm:$0xff] }
  0xb1   :  { %947 = vmatprep.subr.mxu0 %v239_v23  ;;  %883 = vmatpush1.msra.mxu1 %v98_v24  ;;  %v202_v61 = vld [vmem:[#allocation5 + $0x470] sm:$0xff]  ;;  %v187_v62 = vld [vmem:[#allocation5 + $0x3f8] sm:$0xff] }
  0xb2   :  { %948 = vmatpush1.msra.mxu0 %v238_v25  ;;  %884 = vmatprep.subr.mxu1 %v95_v26  ;;  %v199_v63 = vld [vmem:[#allocation5 + $0x458] sm:$0xff]  ;;  %v186_v0 = vld [vmem:[#allocation5 + $0x3f0] sm:$0xff] }
  0xb3   :  { %949 = vmatprep.subr.mxu0 %v235_v27  ;;  %885 = vmatpush1.msra.mxu1 %v94_v28  ;;  %v198_v1 = vld [vmem:[#allocation5 + $0x450] sm:$0xff]  ;;  %v183_v3 = vld [vmem:[#allocation5 + $0x3d8] sm:$0xff] }
  0xb4   :  { %950 = vmatpush1.msra.mxu0 %v234_v29  ;;  %886 = vmatprep.subr.mxu1 %v91_v30  ;;  %v195_v4 = vld [vmem:[#allocation5 + $0x438] sm:$0xff]  ;;  %v182_v5 = vld [vmem:[#allocation5 + $0x3d0] sm:$0xff] }
  0xb5   :  { %951 = vmatprep.subr.mxu0 %v231_v31  ;;  %887 = vmatpush1.msra.mxu1 %v90_v32  ;;  %v194_v6 = vld [vmem:[#allocation5 + $0x430] sm:$0xff]  ;;  %v179_v8 = vld [vmem:[#allocation5 + $0x3b8] sm:$0xff] }
  0xb6   :  { %952 = vmatpush1.msra.mxu0 %v230_v33  ;;  %888 = vmatprep.subr.mxu1 %v87_v34  ;;  %v191_v10 = vld [vmem:[#allocation5 + $0x418] sm:$0xff]  ;;  %v178_v11 = vld [vmem:[#allocation5 + $0x3b0] sm:$0xff] }
  0xb7   :  { %953 = vmatprep.subr.mxu0 %v227_v35  ;;  %889 = vmatpush1.msra.mxu1 %v86_v36  ;;  %v190_v12 = vld [vmem:[#allocation5 + $0x410] sm:$0xff]  ;;  %v175_v13 = vld [vmem:[#allocation5 + $0x398] sm:$0xff] }
  0xb8   :  { %954 = vmatpush1.msra.mxu0 %v226_v37  ;;  %890 = vmatprep.subr.mxu1 %v83_v38  ;;  %v315_v14 = vld [vmem:[#allocation5 + $0x7f8] sm:$0xff]  ;;  %v174_v15 = vld [vmem:[#allocation5 + $0x390] sm:$0xff] }
  0xb9   :  { %955 = vmatprep.subr.mxu0 %v223_v39  ;;  %891 = vmatpush1.msra.mxu1 %v82_v40  ;;  %v314_v16 = vld [vmem:[#allocation5 + $0x7f0] sm:$0xff]  ;;  %v171_v17 = vld [vmem:[#allocation5 + $0x378] sm:$0xff] }
  0xba   :  { %956 = vmatpush1.msra.mxu0 %v222_v41  ;;  %892 = vmatprep.subr.mxu1 %v79_v42  ;;  %v311_v18 = vld [vmem:[#allocation5 + $0x7d8] sm:$0xff]  ;;  %v170_v19 = vld [vmem:[#allocation5 + $0x370] sm:$0xff] }
  0xbb   :  { %957 = vmatprep.subr.mxu0 %v219_v43  ;;  %893 = vmatpush1.msra.mxu1 %v78_v44  ;;  %v310_v20 = vld [vmem:[#allocation5 + $0x7d0] sm:$0xff]  ;;  %v167_v21 = vld [vmem:[#allocation5 + $0x358] sm:$0xff] }
  0xbc   :  { %958 = vmatpush1.msra.mxu0 %v218_v45  ;;  %894 = vmatprep.subr.mxu1 %v75_v46  ;;  %v307_v22 = vld [vmem:[#allocation5 + $0x7b8] sm:$0xff]  ;;  %v166_v23 = vld [vmem:[#allocation5 + $0x350] sm:$0xff] }
  0xbd   :  { %959 = vmatprep.subr.mxu0 %v215_v47  ;;  %895 = vmatpush1.msra.mxu1 %v74_v48  ;;  %v306_v24 = vld [vmem:[#allocation5 + $0x7b0] sm:$0xff]  ;;  %v163_v25 = vld [vmem:[#allocation5 + $0x338] sm:$0xff] }
  0xbe   :  { %960 = vmatpush1.msra.mxu0 %v214_v49  ;;  %896 = vmatprep.subr.mxu1 %v71_v50  ;;  %v303_v26 = vld [vmem:[#allocation5 + $0x798] sm:$0xff]  ;;  %v162_v27 = vld [vmem:[#allocation5 + $0x330] sm:$0xff] }
  0xbf   :  { %961 = vmatprep.subr.mxu0 %v211_v51  ;;  %897 = vmatpush1.msra.mxu1 %v70_v52  ;;  %v302_v28 = vld [vmem:[#allocation5 + $0x790] sm:$0xff]  ;;  %v159_v29 = vld [vmem:[#allocation5 + $0x318] sm:$0xff] }
  0xc0   :  { %962 = vmatpush1.msra.mxu0 %v210_v53  ;;  %898 = vmatprep.subr.mxu1 %v67_v54  ;;  %v299_v30 = vld [vmem:[#allocation5 + $0x778] sm:$0xff]  ;;  %v158_v31 = vld [vmem:[#allocation5 + $0x310] sm:$0xff] }
  0xc1   :  { %963 = vmatprep.subr.mxu0 %v207_v55  ;;  %899 = vmatpush1.msra.mxu1 %v66_v56  ;;  %v298_v32 = vld [vmem:[#allocation5 + $0x770] sm:$0xff]  ;;  %v155_v33 = vld [vmem:[#allocation5 + $0x2f8] sm:$0xff] }
  0xc2   :  { %964 = vmatpush1.msra.mxu0 %v206_v57  ;;  %900 = vmatprep.subr.mxu1 %v63_v58  ;;  %v295_v34 = vld [vmem:[#allocation5 + $0x758] sm:$0xff]  ;;  %v154_v35 = vld [vmem:[#allocation5 + $0x2f0] sm:$0xff] }
  0xc3   :  { %965 = vmatprep.subr.mxu0 %v203_v59  ;;  %901 = vmatpush1.msra.mxu1 %v62_v60  ;;  %v294_v36 = vld [vmem:[#allocation5 + $0x750] sm:$0xff]  ;;  %v151_v37 = vld [vmem:[#allocation5 + $0x2d8] sm:$0xff] }
  0xc4   :  { %966 = vmatpush1.msra.mxu0 %v202_v61  ;;  %902 = vmatprep.subr.mxu1 %v187_v62  ;;  %v291_v38 = vld [vmem:[#allocation5 + $0x738] sm:$0xff]  ;;  %v150_v39 = vld [vmem:[#allocation5 + $0x2d0] sm:$0xff] }
  0xc5   :  { %967 = vmatprep.subr.mxu0 %v199_v63  ;;  %903 = vmatpush2.msra.mxu1 %v186_v0  ;;  %v290_v40 = vld [vmem:[#allocation5 + $0x730] sm:$0xff]  ;;  %v147_v41 = vld [vmem:[#allocation5 + $0x2b8] sm:$0xff] }
  0xc6   :  { %968 = vmatpush1.msra.mxu0 %v198_v1  ;;  %904 = vmatprep.subr.mxu1 %v183_v3  ;;  %v287_v42 = vld [vmem:[#allocation5 + $0x718] sm:$0xff]  ;;  %v146_v43 = vld [vmem:[#allocation5 + $0x2b0] sm:$0xff] }
  0xc7   :  { %969 = vmatprep.subr.mxu0 %v195_v4  ;;  %905 = vmatpush2.msra.mxu1 %v182_v5  ;;  %v286_v44 = vld [vmem:[#allocation5 + $0x710] sm:$0xff]  ;;  %v143_v45 = vld [vmem:[#allocation5 + $0x298] sm:$0xff]  ;;  %v1182_v4 = vld [vmem:[#allocation2 + $0x8] sm:$0xff] }
  0xc8   :  { %970 = vmatpush1.msra.mxu0 %v194_v6  ;;  %906 = vmatprep.subr.mxu1 %v179_v8  ;;  %v283_v46 = vld [vmem:[#allocation5 + $0x6f8] sm:$0xff]  ;;  %v142_v47 = vld [vmem:[#allocation5 + $0x290] sm:$0xff] }
  0xc9   :  { %971 = vmatprep.subr.mxu0 %v191_v10  ;;  %907 = vmatpush2.msra.mxu1 %v178_v11  ;;  %v282_v48 = vld [vmem:[#allocation5 + $0x6f0] sm:$0xff]  ;;  %v139_v49 = vld [vmem:[#allocation5 + $0x278] sm:$0xff] }
  0xca   :  { %972 = vmatpush1.msra.mxu0 %v190_v12  ;;  %908 = vmatprep.subr.mxu1 %v175_v13  ;;  %v279_v50 = vld [vmem:[#allocation5 + $0x6d8] sm:$0xff]  ;;  %v138_v51 = vld [vmem:[#allocation5 + $0x270] sm:$0xff] }
  0xcb   :  { %973 = vmatprep.subr.mxu0 %v315_v14  ;;  %909 = vmatpush2.msra.mxu1 %v174_v15  ;;  %v278_v52 = vld [vmem:[#allocation5 + $0x6d0] sm:$0xff]  ;;  %v135_v53 = vld [vmem:[#allocation5 + $0x258] sm:$0xff] }
  0xcc   :  { %974 = vmatpush2.msra.mxu0 %v314_v16  ;;  %910 = vmatprep.subr.mxu1 %v171_v17  ;;  %v275_v54 = vld [vmem:[#allocation5 + $0x6b8] sm:$0xff]  ;;  %v134_v55 = vld [vmem:[#allocation5 + $0x250] sm:$0xff] }
  0xcd   :  { %975 = vmatprep.subr.mxu0 %v311_v18  ;;  %911 = vmatpush2.msra.mxu1 %v170_v19  ;;  %v274_v56 = vld [vmem:[#allocation5 + $0x6b0] sm:$0xff]  ;;  %v131_v57 = vld [vmem:[#allocation5 + $0x238] sm:$0xff] }
  0xce   :  { %976 = vmatpush2.msra.mxu0 %v310_v20  ;;  %912 = vmatprep.subr.mxu1 %v167_v21  ;;  %v271_v58 = vld [vmem:[#allocation5 + $0x698] sm:$0xff]  ;;  %v130_v59 = vld [vmem:[#allocation5 + $0x230] sm:$0xff] }
  0xcf   :  { %977 = vmatprep.subr.mxu0 %v307_v22  ;;  %913 = vmatpush2.msra.mxu1 %v166_v23  ;;  %v270_v60 = vld [vmem:[#allocation5 + $0x690] sm:$0xff]  ;;  %v127_v61 = vld [vmem:[#allocation5 + $0x218] sm:$0xff] }
  0xd0   :  { %978 = vmatpush2.msra.mxu0 %v306_v24  ;;  %914 = vmatprep.subr.mxu1 %v163_v25  ;;  %v267_v62 = vld [vmem:[#allocation5 + $0x678] sm:$0xff]  ;;  %v126_v63 = vld [vmem:[#allocation5 + $0x210] sm:$0xff] }
  0xd1   :  { %979 = vmatprep.subr.mxu0 %v303_v26  ;;  %915 = vmatpush2.msra.mxu1 %v162_v27  ;;  %v266_v0 = vld [vmem:[#allocation5 + $0x670] sm:$0xff]  ;;  %v263_v1 = vld [vmem:[#allocation5 + $0x658] sm:$0xff] }
  0xd2   :  { %980 = vmatpush2.msra.mxu0 %v302_v28  ;;  %916 = vmatprep.subr.mxu1 %v159_v29  ;;  %v379_v3 = vld [vmem:[#allocation5 + $0x9f8] sm:$0xff]  ;;  %v262_v5 = vld [vmem:[#allocation5 + $0x650] sm:$0xff] }
  0xd3   :  { %981 = vmatprep.subr.mxu0 %v299_v30  ;;  %917 = vmatpush2.msra.mxu1 %v158_v31  ;;  %v378_v6 = vld [vmem:[#allocation5 + $0x9f0] sm:$0xff]  ;;  %v259_v8 = vld [vmem:[#allocation5 + $0x638] sm:$0xff] }
  0xd4   :  { %982 = vmatpush2.msra.mxu0 %v298_v32  ;;  %918 = vmatprep.subr.mxu1 %v155_v33  ;;  %v375_v10 = vld [vmem:[#allocation5 + $0x9d8] sm:$0xff]  ;;  %v258_v11 = vld [vmem:[#allocation5 + $0x630] sm:$0xff] }
  0xd5   :  { %983 = vmatprep.subr.mxu0 %v295_v34  ;;  %919 = vmatpush2.msra.mxu1 %v154_v35  ;;  %v374_v12 = vld [vmem:[#allocation5 + $0x9d0] sm:$0xff]  ;;  %v255_v13 = vld [vmem:[#allocation5 + $0x618] sm:$0xff] }
  0xd6   :  { %984 = vmatpush2.msra.mxu0 %v294_v36  ;;  %920 = vmatprep.subr.mxu1 %v151_v37  ;;  %v371_v14 = vld [vmem:[#allocation5 + $0x9b8] sm:$0xff]  ;;  %v254_v15 = vld [vmem:[#allocation5 + $0x610] sm:$0xff] }
  0xd7   :  { %985 = vmatprep.subr.mxu0 %v291_v38  ;;  %921 = vmatpush2.msra.mxu1 %v150_v39  ;;  %v370_v16 = vld [vmem:[#allocation5 + $0x9b0] sm:$0xff]  ;;  %v367_v17 = vld [vmem:[#allocation5 + $0x998] sm:$0xff] }
  0xd8   :  { %986 = vmatpush2.msra.mxu0 %v290_v40  ;;  %922 = vmatprep.subr.mxu1 %v147_v41  ;;  %v1183_v18 = vld [vmem:[#allocation2 + $0x18] sm:$0xff]  ;;  %v366_v19 = vld [vmem:[#allocation5 + $0x990] sm:$0xff] }
  0xd9   :  { %987 = vmatprep.subr.mxu0 %v287_v42  ;;  %923 = vmatpush2.msra.mxu1 %v146_v43  ;;  %v506_v20 = vld [vmem:[#allocation5 + $0xdf0] sm:$0xff]  ;;  %v363_v22 = vld [vmem:[#allocation5 + $0x978] sm:$0xff] }
  0xda   :  { %988 = vmatpush2.msra.mxu0 %v286_v44  ;;  %924 = vmatprep.subr.mxu1 %v143_v45  ;;  %v1184_v21 = vld [vmem:[#allocation2 + $0x10] sm:$0xff]  ;;  %v503_v23 = vld [vmem:[#allocation5 + $0xdd8] sm:$0xff] }
  0xdb   :  { %989 = vmatprep.subr.mxu0 %v283_v46  ;;  %925 = vmatpush2.msra.mxu1 %v142_v47  ;;  %v362_v24 = vld [vmem:[#allocation5 + $0x970] sm:$0xff]  ;;  %v359_v26 = vld [vmem:[#allocation5 + $0x958] sm:$0xff] }
  0xdc   :  { %990 = vmatpush2.msra.mxu0 %v282_v48  ;;  %926 = vmatprep.subr.mxu1 %v139_v49  ;;  %v502_v25 = vld [vmem:[#allocation5 + $0xdd0] sm:$0xff]  ;;  %v499_v27 = vld [vmem:[#allocation5 + $0xdb8] sm:$0xff] }
  0xdd   :  { %991 = vmatprep.subr.mxu0 %v279_v50  ;;  %927 = vmatpush2.msra.mxu1 %v138_v51  ;;  %v358_v28 = vld [vmem:[#allocation5 + $0x950] sm:$0xff]  ;;  %v355_v30 = vld [vmem:[#allocation5 + $0x938] sm:$0xff] }
  0xde   :  { %992 = vmatpush2.msra.mxu0 %v278_v52  ;;  %928 = vmatprep.subr.mxu1 %v135_v53  ;;  %v498_v29 = vld [vmem:[#allocation5 + $0xdb0] sm:$0xff]  ;;  %v495_v31 = vld [vmem:[#allocation5 + $0xd98] sm:$0xff] }
  0xdf   :  { %993 = vmatprep.subr.mxu0 %v275_v54  ;;  %929 = vmatpush2.msra.mxu1 %v134_v55  ;;  %v354_v32 = vld [vmem:[#allocation5 + $0x930] sm:$0xff]  ;;  %v351_v34 = vld [vmem:[#allocation5 + $0x918] sm:$0xff] }
  0xe0   :  { %994 = vmatpush2.msra.mxu0 %v274_v56  ;;  %930 = vmatprep.subr.mxu1 %v131_v57  ;;  %v494_v33 = vld [vmem:[#allocation5 + $0xd90] sm:$0xff]  ;;  %v491_v35 = vld [vmem:[#allocation5 + $0xd78] sm:$0xff] }
  0xe1   :  { %995 = vmatprep.subr.mxu0 %v271_v58  ;;  %931 = vmatpush2.msra.mxu1 %v130_v59  ;;  %v350_v36 = vld [vmem:[#allocation5 + $0x910] sm:$0xff]  ;;  %v347_v38 = vld [vmem:[#allocation5 + $0x8f8] sm:$0xff] }
  0xe2   :  { %996 = vmatpush2.msra.mxu0 %v270_v60  ;;  %932 = vmatprep.subr.mxu1 %v127_v61  ;;  %v490_v37 = vld [vmem:[#allocation5 + $0xd70] sm:$0xff]  ;;  %v487_v39 = vld [vmem:[#allocation5 + $0xd58] sm:$0xff] }
  0xe3   :  { %997 = vmatprep.subr.mxu0 %v267_v62  ;;  %933 = vmatpush2.msra.mxu1 %v126_v63  ;;  %v346_v40 = vld [vmem:[#allocation5 + $0x8f0] sm:$0xff]  ;;  %v343_v42 = vld [vmem:[#allocation5 + $0x8d8] sm:$0xff] }
  0xe4   :  { %934 = vmatprep.mubr.f32.mxu1 %v1182_v4  ;;  %998 = vmatpush2.msra.mxu0 %v266_v0  ;;  %v486_v41 = vld [vmem:[#allocation5 + $0xd50] sm:$0xff]  ;;  %v483_v43 = vld [vmem:[#allocation5 + $0xd38] sm:$0xff] }
  0xe5   :  { %935 = vmatmul.mubr.f32.vlgmr.msra.gmra.mxu1 %v1308_v2  ;;  %999 = vmatprep.subr.mxu0 %v263_v1  ;;  %v507_v2 = vld [vmem:[#allocation5 + $0xdf8] sm:$0xff]  ;;  %v342_v44 = vld [vmem:[#allocation5 + $0x8d0] sm:$0xff] }
  0xe6   :  { %1012 = vmatprep.subr.mxu1 %v379_v3  ;;  %1000 = vmatpush2.msra.mxu0 %v262_v5  ;;  %v482_v45 = vld [vmem:[#allocation5 + $0xd30] sm:$0xff]  ;;  %v339_v46 = vld [vmem:[#allocation5 + $0x8b8] sm:$0xff] }
  0xe7   :  { %1013 = vmatpush1.msra.mxu1 %v378_v6  ;;  %1001 = vmatprep.subr.mxu0 %v259_v8  ;;  %v479_v47 = vld [vmem:[#allocation5 + $0xd18] sm:$0xff]  ;;  %v338_v48 = vld [vmem:[#allocation5 + $0x8b0] sm:$0xff] }
  0xe8   :  { %1014 = vmatprep.subr.mxu1 %v375_v10  ;;  %1002 = vmatpush2.msra.mxu0 %v258_v11  ;;  %v478_v49 = vld [vmem:[#allocation5 + $0xd10] sm:$0xff]  ;;  %v335_v50 = vld [vmem:[#allocation5 + $0x898] sm:$0xff] }
  0xe9   :  { %1015 = vmatpush1.msra.mxu1 %v374_v12  ;;  %1003 = vmatprep.subr.mxu0 %v255_v13  ;;  %v475_v51 = vld [vmem:[#allocation5 + $0xcf8] sm:$0xff]  ;;  %v334_v52 = vld [vmem:[#allocation5 + $0x890] sm:$0xff] }
  0xea   :  { %1016 = vmatprep.subr.mxu1 %v371_v14  ;;  %1004 = vmatpush2.msra.mxu0 %v254_v15  ;;  %v474_v53 = vld [vmem:[#allocation5 + $0xcf0] sm:$0xff]  ;;  %v331_v54 = vld [vmem:[#allocation5 + $0x878] sm:$0xff] }
  0xeb   :  { %1005 = vmatprep.mubr.f32.mxu0 %v1183_v18  ;;  %1017 = vmatpush1.msra.mxu1 %v370_v16  ;;  %v471_v55 = vld [vmem:[#allocation5 + $0xcd8] sm:$0xff]  ;;  %v330_v56 = vld [vmem:[#allocation5 + $0x870] sm:$0xff] }
  0xec   :  { %1006 = vmatmul.mubr.f32.vlgmr.msra.gmra.mxu0 %v1184_v21  ;;  %1018 = vmatprep.subr.mxu1 %v367_v17  ;;  %v470_v57 = vld [vmem:[#allocation5 + $0xcd0] sm:$0xff]  ;;  %v327_v58 = vld [vmem:[#allocation5 + $0x858] sm:$0xff] }
  0xed   :  { %1083 = vmatprep.subr.mxu0 %v507_v2  ;;  %1019 = vmatpush1.msra.mxu1 %v366_v19  ;;  %v467_v59 = vld [vmem:[#allocation5 + $0xcb8] sm:$0xff]  ;;  %v326_v60 = vld [vmem:[#allocation5 + $0x850] sm:$0xff] }
  0xee   :  { %1084 = vmatpush1.msra.mxu0 %v506_v20  ;;  %1020 = vmatprep.subr.mxu1 %v363_v22  ;;  %v466_v61 = vld [vmem:[#allocation5 + $0xcb0] sm:$0xff]  ;;  %v323_v62 = vld [vmem:[#allocation5 + $0x838] sm:$0xff] }
  0xef   :  { %1085 = vmatprep.subr.mxu0 %v503_v23  ;;  %1021 = vmatpush1.msra.mxu1 %v362_v24  ;;  %v463_v63 = vld [vmem:[#allocation5 + $0xc98] sm:$0xff]  ;;  %v322_v0 = vld [vmem:[#allocation5 + $0x830] sm:$0xff] }
  0xf0   :  { %1086 = vmatpush1.msra.mxu0 %v502_v25  ;;  %1022 = vmatprep.subr.mxu1 %v359_v26  ;;  %v462_v1 = vld [vmem:[#allocation5 + $0xc90] sm:$0xff]  ;;  %v319_v3 = vld [vmem:[#allocation5 + $0x818] sm:$0xff] }
  0xf1   :  { %1087 = vmatprep.subr.mxu0 %v499_v27  ;;  %1023 = vmatpush1.msra.mxu1 %v358_v28  ;;  %v459_v4 = vld [vmem:[#allocation5 + $0xc78] sm:$0xff]  ;;  %v318_v5 = vld [vmem:[#allocation5 + $0x810] sm:$0xff] }
  0xf2   :  { %1088 = vmatpush1.msra.mxu0 %v498_v29  ;;  %1024 = vmatprep.subr.mxu1 %v355_v30  ;;  %v458_v6 = vld [vmem:[#allocation5 + $0xc70] sm:$0xff]  ;;  %v443_v8 = vld [vmem:[#allocation5 + $0xbf8] sm:$0xff] }
  0xf3   :  { %1089 = vmatprep.subr.mxu0 %v495_v31  ;;  %1025 = vmatpush1.msra.mxu1 %v354_v32  ;;  %v455_v10 = vld [vmem:[#allocation5 + $0xc58] sm:$0xff]  ;;  %v442_v11 = vld [vmem:[#allocation5 + $0xbf0] sm:$0xff] }
  0xf4   :  { %1090 = vmatpush1.msra.mxu0 %v494_v33  ;;  %1026 = vmatprep.subr.mxu1 %v351_v34  ;;  %v454_v12 = vld [vmem:[#allocation5 + $0xc50] sm:$0xff]  ;;  %v439_v13 = vld [vmem:[#allocation5 + $0xbd8] sm:$0xff] }
  0xf5   :  { %1091 = vmatprep.subr.mxu0 %v491_v35  ;;  %1027 = vmatpush1.msra.mxu1 %v350_v36  ;;  %v451_v14 = vld [vmem:[#allocation5 + $0xc38] sm:$0xff]  ;;  %v438_v15 = vld [vmem:[#allocation5 + $0xbd0] sm:$0xff] }
  0xf6   :  { %1092 = vmatpush1.msra.mxu0 %v490_v37  ;;  %1028 = vmatprep.subr.mxu1 %v347_v38  ;;  %v450_v16 = vld [vmem:[#allocation5 + $0xc30] sm:$0xff]  ;;  %v435_v17 = vld [vmem:[#allocation5 + $0xbb8] sm:$0xff] }
  0xf7   :  { %1093 = vmatprep.subr.mxu0 %v487_v39  ;;  %1029 = vmatpush1.msra.mxu1 %v346_v40  ;;  %v447_v2 = vld [vmem:[#allocation5 + $0xc18] sm:$0xff]  ;;  %v434_v18 = vld [vmem:[#allocation5 + $0xbb0] sm:$0xff] }
  0xf8   :  { %1094 = vmatpush1.msra.mxu0 %v486_v41  ;;  %1030 = vmatprep.subr.mxu1 %v343_v42  ;;  %v446_v19 = vld [vmem:[#allocation5 + $0xc10] sm:$0xff]  ;;  %v431_v20 = vld [vmem:[#allocation5 + $0xb98] sm:$0xff] }
  0xf9   :  { %1095 = vmatprep.subr.mxu0 %v483_v43  ;;  %1031 = vmatpush1.msra.mxu1 %v342_v44  ;;  %v559_v21 = vld [vmem:[#allocation5 + $0xf98] sm:$0xff]  ;;  %v430_v22 = vld [vmem:[#allocation5 + $0xb90] sm:$0xff] }
  0xfa   :  { %1096 = vmatpush1.msra.mxu0 %v482_v45  ;;  %1032 = vmatprep.subr.mxu1 %v339_v46  ;;  %v558_v23 = vld [vmem:[#allocation5 + $0xf90] sm:$0xff]  ;;  %v427_v24 = vld [vmem:[#allocation5 + $0xb78] sm:$0xff] }
  0xfb   :  { %1097 = vmatprep.subr.mxu0 %v479_v47  ;;  %1033 = vmatpush1.msra.mxu1 %v338_v48  ;;  %v555_v25 = vld [vmem:[#allocation5 + $0xf78] sm:$0xff]  ;;  %v426_v26 = vld [vmem:[#allocation5 + $0xb70] sm:$0xff] }
  0xfc   :  { %1098 = vmatpush1.msra.mxu0 %v478_v49  ;;  %1034 = vmatprep.subr.mxu1 %v335_v50  ;;  %v554_v27 = vld [vmem:[#allocation5 + $0xf70] sm:$0xff]  ;;  %v423_v28 = vld [vmem:[#allocation5 + $0xb58] sm:$0xff] }
  0xfd   :  { %1099 = vmatprep.subr.mxu0 %v475_v51  ;;  %1035 = vmatpush1.msra.mxu1 %v334_v52  ;;  %v551_v29 = vld [vmem:[#allocation5 + $0xf58] sm:$0xff]  ;;  %v422_v30 = vld [vmem:[#allocation5 + $0xb50] sm:$0xff] }
  0xfe   :  { %1100 = vmatpush1.msra.mxu0 %v474_v53  ;;  %1036 = vmatprep.subr.mxu1 %v331_v54  ;;  %v550_v31 = vld [vmem:[#allocation5 + $0xf50] sm:$0xff]  ;;  %v419_v32 = vld [vmem:[#allocation5 + $0xb38] sm:$0xff] }
  0xff   :  { %1101 = vmatprep.subr.mxu0 %v471_v55  ;;  %1037 = vmatpush1.msra.mxu1 %v330_v56  ;;  %v547_v33 = vld [vmem:[#allocation5 + $0xf38] sm:$0xff]  ;;  %v418_v34 = vld [vmem:[#allocation5 + $0xb30] sm:$0xff] }
 0x100   :  { %1102 = vmatpush1.msra.mxu0 %v470_v57  ;;  %1038 = vmatprep.subr.mxu1 %v327_v58  ;;  %v546_v35 = vld [vmem:[#allocation5 + $0xf30] sm:$0xff]  ;;  %v415_v36 = vld [vmem:[#allocation5 + $0xb18] sm:$0xff] }
 0x101   :  { %1103 = vmatprep.subr.mxu0 %v467_v59  ;;  %1039 = vmatpush1.msra.mxu1 %v326_v60  ;;  %v543_v37 = vld [vmem:[#allocation5 + $0xf18] sm:$0xff]  ;;  %v414_v38 = vld [vmem:[#allocation5 + $0xb10] sm:$0xff] }
 0x102   :  { %1104 = vmatpush1.msra.mxu0 %v466_v61  ;;  %1040 = vmatprep.subr.mxu1 %v323_v62  ;;  %v542_v39 = vld [vmem:[#allocation5 + $0xf10] sm:$0xff]  ;;  %v411_v40 = vld [vmem:[#allocation5 + $0xaf8] sm:$0xff] }
 0x103   :  { %1105 = vmatprep.subr.mxu0 %v463_v63  ;;  %1041 = vmatpush1.msra.mxu1 %v322_v0  ;;  %v539_v41 = vld [vmem:[#allocation5 + $0xef8] sm:$0xff]  ;;  %v410_v42 = vld [vmem:[#allocation5 + $0xaf0] sm:$0xff] }
 0x104   :  { %1106 = vmatpush1.msra.mxu0 %v462_v1  ;;  %1042 = vmatprep.subr.mxu1 %v319_v3  ;;  %v538_v43 = vld [vmem:[#allocation5 + $0xef0] sm:$0xff]  ;;  %v407_v44 = vld [vmem:[#allocation5 + $0xad8] sm:$0xff] }
 0x105   :  { %1107 = vmatprep.subr.mxu0 %v459_v4  ;;  %1043 = vmatpush1.msra.mxu1 %v318_v5  ;;  %v535_v45 = vld [vmem:[#allocation5 + $0xed8] sm:$0xff]  ;;  %v406_v46 = vld [vmem:[#allocation5 + $0xad0] sm:$0xff] }
 0x106   :  { %1108 = vmatpush1.msra.mxu0 %v458_v6  ;;  %1044 = vmatprep.subr.mxu1 %v443_v8  ;;  %v534_v47 = vld [vmem:[#allocation5 + $0xed0] sm:$0xff]  ;;  %v403_v48 = vld [vmem:[#allocation5 + $0xab8] sm:$0xff] }
 0x107   :  { %1109 = vmatprep.subr.mxu0 %v455_v10  ;;  %1045 = vmatpush2.msra.mxu1 %v442_v11  ;;  %v531_v49 = vld [vmem:[#allocation5 + $0xeb8] sm:$0xff]  ;;  %v402_v50 = vld [vmem:[#allocation5 + $0xab0] sm:$0xff] }
 0x108   :  { %1110 = vmatpush1.msra.mxu0 %v454_v12  ;;  %1046 = vmatprep.subr.mxu1 %v439_v13  ;;  %v530_v51 = vld [vmem:[#allocation5 + $0xeb0] sm:$0xff]  ;;  %v399_v52 = vld [vmem:[#allocation5 + $0xa98] sm:$0xff]  ;;  %v562_v13 = vlaneseq }
 0x109   :  { %1111 = vmatprep.subr.mxu0 %v451_v14  ;;  %1047 = vmatpush2.msra.mxu1 %v438_v15  ;;  %v527_v53 = vld [vmem:[#allocation5 + $0xe98] sm:$0xff]  ;;  %v398_v54 = vld [vmem:[#allocation5 + $0xa90] sm:$0xff] }
 0x10a   :  { %1112 = vmatpush1.msra.mxu0 %v450_v16  ;;  %1048 = vmatprep.subr.mxu1 %v435_v17  ;;  %v526_v55 = vld [vmem:[#allocation5 + $0xe90] sm:$0xff]  ;;  %v395_v56 = vld [vmem:[#allocation5 + $0xa78] sm:$0xff]  ;;  %v563_v14 = vshrl.u32 %v562_v13, 7  ;;  %v560_v16 = vld [vmem:[#allocation7] sm:$0xf] }
 0x10b   :  { %1113 = vmatprep.subr.mxu0 %v447_v2  ;;  %1049 = vmatpush2.msra.mxu1 %v434_v18  ;;  %v523_v57 = vld [vmem:[#allocation5 + $0xe78] sm:$0xff]  ;;  %v394_v58 = vld [vmem:[#allocation5 + $0xa70] sm:$0xff] }
 0x10c   :  { %1114 = vmatpush1.msra.mxu0 %v446_v19  ;;  %1050 = vmatprep.subr.mxu1 %v431_v20  ;;  %v522_v59 = vld [vmem:[#allocation5 + $0xe70] sm:$0xff]  ;;  %v391_v60 = vld [vmem:[#allocation5 + $0xa58] sm:$0xff]  ;;  %v564_v15 = vsub.s32 0, %v563_v14  ;;  %v568_v17 = vsub.s32 1, %v563_v14 }
 0x10d   :  { %1121 = vmatprep.subr.mxu0 %v559_v21  ;;  %1051 = vmatpush2.msra.mxu1 %v430_v22  ;;  %v519_v61 = vld [vmem:[#allocation5 + $0xe58] sm:$0xff]  ;;  %v390_v62 = vld [vmem:[#allocation5 + $0xa50] sm:$0xff] }
 0x10e   :  { %1122 = vmatpush2.msra.mxu0 %v558_v23  ;;  %1052 = vmatprep.subr.mxu1 %v427_v24  ;;  %v518_v63 = vld [vmem:[#allocation5 + $0xe50] sm:$0xff]  ;;  %v387_v0 = vld [vmem:[#allocation5 + $0xa38] sm:$0xff]  ;;  %v565_v18 = vrot.slane %v560_v16, %v564_v15  ;;  %v569_v19 = vrot.slane %v560_v16, %v568_v17 }
 0x10f   :  { %1123 = vmatprep.subr.mxu0 %v555_v25  ;;  %1053 = vmatpush2.msra.mxu1 %v426_v26  ;;  %v515_v1 = vld [vmem:[#allocation5 + $0xe38] sm:$0xff]  ;;  %v386_v3 = vld [vmem:[#allocation5 + $0xa30] sm:$0xff] }
 0x110   :  { %1124 = vmatpush2.msra.mxu0 %v554_v27  ;;  %1054 = vmatprep.subr.mxu1 %v423_v28  ;;  %v514_v4 = vld [vmem:[#allocation5 + $0xe30] sm:$0xff]  ;;  %v383_v5 = vld [vmem:[#allocation5 + $0xa18] sm:$0xff] }
 0x111   :  { %1125 = vmatprep.subr.mxu0 %v551_v29  ;;  %1055 = vmatpush2.msra.mxu1 %v422_v30  ;;  %v511_v6 = vld [vmem:[#allocation5 + $0xe18] sm:$0xff]  ;;  %v382_v8 = vld [vmem:[#allocation5 + $0xa10] sm:$0xff] }
 0x112   :  { %1126 = vmatpush2.msra.mxu0 %v550_v31  ;;  %1056 = vmatprep.subr.mxu1 %v419_v32  ;;  %v510_v10 = vld [vmem:[#allocation5 + $0xe10] sm:$0xff]  ;;  %v1185_v11 = vld [vmem:[#allocation2 + $0x38] sm:$0xff] }
 0x113   :  { %1127 = vmatprep.subr.mxu0 %v547_v33  ;;  %1057 = vmatpush2.msra.mxu1 %v418_v34  ;;  %v1186_v12 = vld [vmem:[#allocation2 + $0x30] sm:$0xff]  ;;  %v572_v33 = vsub.s32 2, %v563_v14  ;;  %v576_v34 = vsub.s32 3, %v563_v14 }
 0x114   :  { %1128 = vmatpush2.msra.mxu0 %v546_v35  ;;  %1058 = vmatprep.subr.mxu1 %v415_v36 }
 0x115   :  { %1129 = vmatprep.subr.mxu0 %v543_v37  ;;  %1059 = vmatpush2.msra.mxu1 %v414_v38  ;;  %v573_v36 = vrot.slane %v560_v16, %v572_v33  ;;  %v577_v38 = vrot.slane %v560_v16, %v576_v34 }
 0x116   :  { %1130 = vmatpush2.msra.mxu0 %v542_v39  ;;  %1060 = vmatprep.subr.mxu1 %v411_v40 }
 0x117   :  { %1131 = vmatprep.subr.mxu0 %v539_v41  ;;  %1061 = vmatpush2.msra.mxu1 %v410_v42 }
 0x118   :  { %1132 = vmatpush2.msra.mxu0 %v538_v43  ;;  %1062 = vmatprep.subr.mxu1 %v407_v44 }
 0x119   :  { %1133 = vmatprep.subr.mxu0 %v535_v45  ;;  %1063 = vmatpush2.msra.mxu1 %v406_v46 }
 0x11a   :  { %1134 = vmatpush2.msra.mxu0 %v534_v47  ;;  %1064 = vmatprep.subr.mxu1 %v403_v48 }
 0x11b   :  { %1135 = vmatprep.subr.mxu0 %v531_v49  ;;  %1065 = vmatpush2.msra.mxu1 %v402_v50 }
 0x11c   :  { %1136 = vmatpush2.msra.mxu0 %v530_v51  ;;  %1066 = vmatprep.subr.mxu1 %v399_v52 }
 0x11d   :  { %1137 = vmatprep.subr.mxu0 %v527_v53  ;;  %1067 = vmatpush2.msra.mxu1 %v398_v54 }
 0x11e   :  { %1138 = vmatpush2.msra.mxu0 %v526_v55  ;;  %1068 = vmatprep.subr.mxu1 %v395_v56 }
 0x11f   :  { %1139 = vmatprep.subr.mxu0 %v523_v57  ;;  %1069 = vmatpush2.msra.mxu1 %v394_v58 }
 0x120   :  { %1140 = vmatpush2.msra.mxu0 %v522_v59  ;;  %1070 = vmatprep.subr.mxu1 %v391_v60 }
 0x121   :  { %1141 = vmatprep.subr.mxu0 %v519_v61  ;;  %1071 = vmatpush2.msra.mxu1 %v390_v62 }
 0x122   :  { %1142 = vmatpush2.msra.mxu0 %v518_v63  ;;  %1072 = vmatprep.subr.mxu1 %v387_v0 }
 0x123   :  { %1143 = vmatprep.subr.mxu0 %v515_v1  ;;  %1073 = vmatpush2.msra.mxu1 %v386_v3 }
 0x124   :  { %1144 = vmatpush2.msra.mxu0 %v514_v4  ;;  %1074 = vmatprep.subr.mxu1 %v383_v5 }
 0x125   :  { %1145 = vmatprep.subr.mxu0 %v511_v6  ;;  %1075 = vmatpush2.msra.mxu1 %v382_v8 }
 0x126   :  { %1076 = vmatprep.mubr.f32.mxu1 %v1312_v7  ;;  %1146 = vmatpush2.msra.mxu0 %v510_v10 }
 0x127   :  { %1175 = vmatprep.mubr.msk.f32.mxu0 %vm582_vm0, %v1185_v11  ;;  %1077 = vmatmul.mubr.f32.vlgmr.msra.gmra.mxu1 %v1314_v9  ;;  %v652_v2 = vpop.f32.mrf.mxu0 }
 0x128   :  { %1148 = vmatmul.mubr.f32.vlgmr.msra.gmra.mxu0 %v1186_v12  ;;  %v723_v20 = vpop.f32.mrf.mxu1  ;;  %v653_v22 = vadd.f32 %v652_v2, %v565_v18 }
 0x129   :  { %v654_v21 = vpop.f32.mrf.mxu0 }
 0x12a   :  { %v655_v7 = vadd.f32 %v654_v21, %v569_v19  ;;  %v725_v23 = vpop.f32.mrf.mxu1  ;;  %v724_v24 = vadd.f32 %v723_v20, %v653_v22 }
 0x12c   :  { %v726_v27 = vadd.f32 %v725_v23, %v655_v7 }
 0x163   :  { %v865_v25 = vpop.f32.mrf.mxu1 }
 0x165   :  { %v867_v31 = vpop.f32.mrf.mxu1 }
 0x16a   :  { %v794_v26 = vpop.f32.mrf.mxu0 }
 0x16b   :  { %v795_v9 = vadd.f32 %v794_v26, %v724_v24 }
 0x16c   :  { %v796_v28 = vpop.f32.mrf.mxu0 }
 0x16d   :  { %v866_v29 = vadd.f32 %v865_v25, %v795_v9  ;;  %v797_v30 = vadd.f32 %v796_v28, %v726_v27 }
 0x16f   :  { %1154 = vst [vmem:[#allocation8] sm:$0xff] %v866_v29  ;;  %v868_v32 = vadd.f32 %v867_v31, %v797_v30 }
 0x171   :  { %1155 = vst [vmem:[#allocation8 + $0x8] sm:$0xff] %v868_v32 }
 0x1a5   :  { %v936_v35 = vpop.f32.mrf.mxu1 }
 0x1a6   :  { %v937_v40 = vadd.f32 %v936_v35, %v573_v36 }
 0x1a7   :  { %v938_v39 = vpop.f32.mrf.mxu1 }
 0x1a8   :  { %v939_v42 = vadd.f32 %v938_v39, %v577_v38 }
 0x1ac   :  { %v1007_v37 = vpop.f32.mrf.mxu0 }
 0x1ad   :  { %v1008_v43 = vadd.f32 %v1007_v37, %v937_v40 }
 0x1ae   :  { %v1009_v41 = vpop.f32.mrf.mxu0 }
 0x1af   :  { %v1010_v46 = vadd.f32 %v1009_v41, %v939_v42 }
 0x1e7   :  { %v1078_v44 = vpop.f32.mrf.mxu1 }
 0x1e8   :  { %v1149_v45 = vpop.f32.mrf.mxu0  ;;  %v1079_v47 = vadd.f32 %v1078_v44, %v1008_v43 }
 0x1e9   :  { %v1080_v48 = vpop.f32.mrf.mxu1 }
 0x1ea   :  { %v1150_v49 = vadd.f32 %v1149_v45, %v1079_v47  ;;  %v1081_v50 = vadd.f32 %v1080_v48, %v1010_v46  ;;  %v1151_v51 = vpop.f32.mrf.mxu0 }
 0x1ec   :  { %1156 = vst [vmem:[#allocation8 + $0x10] sm:$0xff] %v1150_v49  ;;  %v1152_v52 = vadd.f32 %v1151_v51, %v1081_v50 }
 0x1ee   :  { %1157 = vst [vmem:[#allocation8 + $0x18] sm:$0xff] %v1152_v52 }
 0x1ef   :  { %1258 = shalt.err (!%p1255_p5)
}
 0x1f0   :  { %1167 = dma.vmem_to_hbm [thread:$0]  %s1165_s2, 512, %s1328_s3, [#allocation4]  }
 0x1f1   :  { %1271 = dma.done.wait [#allocation4], 512  }
 0x1f2   :  { %1272 = vsyncadd [#allocation4], 4294966784 }
 0x1f3   :  { %1171 = vsyncpa [#allocation3], 1 }
 0x1f4   :  { %1172 = vsyncpa [#allocation6], 1 }
 0x1f5   :  { %1173 = vsyncpa [#allocation4], 1 }

</bundles_post_ra>
